<compile_context>
chip_gen: v5e
topology: v5e:2x2
jax: 0.10.0
libtpu: 0.0.40
codegen_flags: <defaults>
</compile_context>

<pallas_src>
import jax
import jax.numpy as jnp
from jax import lax
from jax.experimental import pallas as pl
from jax.experimental.pallas import tpu as pltpu
import numpy as np


def make_lstm_kernel(seq_len: int, hidden: int, batch_block: int, input_size: int):
    T, H, BB, I = seq_len, hidden, batch_block, input_size
    H4 = 4 * H

    def lstm_gates(g, c_prev):
        # g: (BB, 4H) f32 pre-activations in PyTorch gate order [i, f, g, o].
        sg = jax.nn.sigmoid(g)   # one full-tile EUP call
        tg = jnp.tanh(g)         # one full-tile EUP call
        i_g = sg[:, 0 * H:1 * H]
        f_g = sg[:, 1 * H:2 * H]
        g_g = tg[:, 2 * H:3 * H]
        o_g = sg[:, 3 * H:4 * H]
        c_new = f_g * c_prev + i_g * g_g
        h_new = o_g * jnp.tanh(c_new)
        return h_new, c_new

    def kernel(x_ref,      # (T, BB, I)  f32  time-major input block
               wih0_ref,   # (I, 4H)     f32  layer-0 input weight
               b0_ref,     # (1, 4H)     f32  b_ih0 + b_hh0
               wbig_ref,   # (2H, 8H)    bf16 [[W_ih1 | W_hh0],[W_hh1 | 0]]
               b1_ref,     # (1, 4H)     f32  b_ih1 + b_hh1
               wfc_ref,    # (1, H)      f32  fc weight row
               bfc_ref,    # (1, 1)      f32
               out_ref):   # (BB, 1)     f32
        # ---- hoisted weight / bias loads (once per invocation, not per step) ----
        wih0 = wih0_ref[...]
        b0 = b0_ref[...]
        wbig = wbig_ref[...]          # bf16, stays resident across the loop
        b1 = b1_ref[...]

        zeros_h = jnp.zeros((BB, H), jnp.float32)
        zeros_g = jnp.zeros((BB, H4), jnp.float32)

        def step(t, carry):
            c0p, h1p, c1p, pre0p = carry          # pre0p = h0(t-1) @ W_hh0
            # layer-0 input projection — depends only on x, off the recurrent chain
            xt = x_ref[t]                         # (BB, I)
            if I == 1:
                xp = xt * wih0 + b0               # VPU broadcast-multiply, exact
            else:
                xp = jnp.dot(xt, wih0, preferred_element_type=jnp.float32) + b0
            # layer-0 gates
            h0n, c0n = lstm_gates(xp + pre0p, c0p)
            # ---- single fused MXU push per timestep (bf16 operands, f32 acc) ----
            # [h0(t), h1(t-1)] @ [[W_ih1 | W_hh0],[W_hh1 | 0]] -> (BB, 8H)
            x1 = jnp.concatenate([h0n, h1p], axis=-1).astype(jnp.bfloat16)
            fused = jnp.dot(x1, wbig, preferred_element_type=jnp.float32)
            gl1 = fused[:, :H4] + b1              # layer-1 pre-activations
            pre0n = fused[:, H4:]                 # h0(t) @ W_hh0 for step t+1
            # dropout between layers is identity in eval mode
            h1n, c1n = lstm_gates(gl1, c1p)
            return (c0n, h1n, c1n, pre0n)

        unroll = True if T <= 16 else 8
        _, h1_last, _, _ = lax.fori_loop(
            0, T, step, (zeros_h, zeros_h, zeros_h, zeros_g), unroll=unroll)

        # fc head: VPU multiply + lane reduce (no MXU push for a single output lane)
        out_ref[...] = (jnp.sum(h1_last * wfc_ref[...], axis=-1, keepdims=True)
                        + bfc_ref[...])

    return kernel


def lstm_predictor_forward(x, params):
    """x: (batch, seq, input_size) float32 -> (batch, 1) float32."""
    B, T, I = x.shape
    H = params["whh_l0"].shape[0]
    H4 = 4 * H
    x = x.astype(jnp.float32)

    # Pad batch to full f32 sublanes (>=8) and pick a batch block for the grid axis.
    if B <= 128:
        BB = max(8, -(-B // 8) * 8)
        B_pad = BB
    else:
        BB = 128
        B_pad = -(-B // 128) * 128
    num_blocks = B_pad // BB

    # time-major input block (tiny transpose/pad on HBM once, outside the hot loop)
    x_t = jnp.transpose(x, (1, 0, 2))                              # (T, B, I)
    if B_pad != B:
        x_t = jnp.pad(x_t, ((0, 0), (0, B_pad - B), (0, 0)))       # (T, B_pad, I)

    # Block-diagonal fused recurrent weight, bf16 (MXU-native on v5e/v6e/v7x):
    #   [[W_ih1 | W_hh0],
    #    [W_hh1 |   0  ]]   shape (2H, 8H)
    top = jnp.concatenate([params["wih_l1"], params["whh_l0"]], axis=1)
    bot = jnp.concatenate([params["whh_l1"],
                           jnp.zeros((H, H4), jnp.float32)], axis=1)
    wbig = jnp.concatenate([top, bot], axis=0).astype(jnp.bfloat16)   # (2H, 8H)

    kernel = make_lstm_kernel(T, H, BB, I)

    out = pl.pallas_call(
        kernel,
        out_shape=jax.ShapeDtypeStruct((B_pad, 1), jnp.float32),
        grid=(num_blocks,),
        in_specs=[
            pl.BlockSpec((T, BB, I), lambda g: (0, g, 0)),     # x (time-major)
            pl.BlockSpec((I, H4), lambda g: (0, 0)),           # W_ih0
            pl.BlockSpec((1, H4), lambda g: (0, 0)),           # b0
            pl.BlockSpec((2 * H, 8 * H), lambda g: (0, 0)),    # fused W (bf16)
            pl.BlockSpec((1, H4), lambda g: (0, 0)),           # b1
            pl.BlockSpec((1, H), lambda g: (0, 0)),            # fc weight row
            pl.BlockSpec((1, 1), lambda g: (0, 0)),            # fc bias
        ],
        out_specs=pl.BlockSpec((BB, 1), lambda g: (g, 0)),
        compiler_params=pltpu.CompilerParams(
            dimension_semantics=("parallel",)),                # v7x: shard over TCs
    )(x_t, params["wih_l0"], params["b_l0"], wbig, params["b_l1"],
      params["wfc_row"], params["bfc"])
    return out[:B]


def init_params(key, input_size: int, hidden: int):
    """Deterministic init mimicking PyTorch LSTM/Linear uniform(-1/sqrt(H), 1/sqrt(H)).
    Weights are stored pre-transposed: (in_dim, 4H) for the kernel's x @ W layout."""
    H = hidden
    k = 1.0 / np.sqrt(H)
    keys = jax.random.split(key, 10)
    u = lambda kk, shape: jax.random.uniform(kk, shape, jnp.float32, -k, k)

    wih_l0 = u(keys[0], (4 * H, input_size))   # torch layout (4H, I)
    whh_l0 = u(keys[1], (4 * H, H))
    bih_l0 = u(keys[2], (4 * H,))
    bhh_l0 = u(keys[3], (4 * H,))
    wih_l1 = u(keys[4], (4 * H, H))
    whh_l1 = u(keys[5], (4 * H, H))
    bih_l1 = u(keys[6], (4 * H,))
    bhh_l1 = u(keys[7], (4 * H,))
    wfc = u(keys[8], (1, H))                   # torch Linear layout (1, H)
    bfc = u(keys[9], (1,))

    return {
        "wih_l0": wih_l0.T,                              # (I, 4H)
        "whh_l0": whh_l0.T,                              # (H, 4H)
        "b_l0": (bih_l0 + bhh_l0).reshape(1, 4 * H),     # (1, 4H)
        "wih_l1": wih_l1.T,                              # (H, 4H)
        "whh_l1": whh_l1.T,                              # (H, 4H)
        "b_l1": (bih_l1 + bhh_l1).reshape(1, 4 * H),     # (1, 4H)
        "wfc_row": wfc,                                  # (1, H)
        "bfc": bfc.reshape(1, 1),                        # (1, 1)
    }


def reference_forward_np(x, params):
    """Pure-numpy f32 reference of the same eval-mode LSTM forward."""
    x = np.asarray(x, np.float32)
    wih0 = np.asarray(params["wih_l0"]); whh0 = np.asarray(params["whh_l0"])
    b0 = np.asarray(params["b_l0"])
    wih1 = np.asarray(params["wih_l1"]); whh1 = np.asarray(params["whh_l1"])
    b1 = np.asarray(params["b_l1"])
    wfc = np.asarray(params["wfc_row"]); bfc = np.asarray(params["bfc"])

    B, T, _ = x.shape
    H = whh0.shape[0]
    sigmoid = lambda z: 1.0 / (1.0 + np.exp(-z))

    def run_layer(inp, wih, whh, b):
        h = np.zeros((B, H), np.float32)
        c = np.zeros((B, H), np.float32)
        outs = []
        for t in range(T):
            g = inp[:, t, :] @ wih + h @ whh + b
            i_g = sigmoid(g[:, 0 * H:1 * H])
            f_g = sigmoid(g[:, 1 * H:2 * H])
            g_g = np.tanh(g[:, 2 * H:3 * H])
            o_g = sigmoid(g[:, 3 * H:4 * H])
            c = f_g * c + i_g * g_g
            h = o_g * np.tanh(c)
            outs.append(h)
        return np.stack(outs, axis=1)

    y0 = run_layer(x, wih0, whh0, b0)
    y1 = run_layer(y0, wih1, whh1, b1)
    return y1[:, -1, :] @ wfc.T + bfc


if __name__ == "__main__":
    # small shapes consistent with the module: input_size=1, 2 layers, small hidden
    batch, seq, input_size, hidden = 2, 8, 1, 32

    key = jax.random.PRNGKey(0)
    k_x, k_p = jax.random.split(key)
    x = jax.random.normal(k_x, (batch, seq, input_size), jnp.float32)
    params = init_params(k_p, input_size, hidden)

    pred = lstm_predictor_forward(x, params)
    pred = jax.block_until_ready(pred)

    ref = reference_forward_np(np.asarray(x), params)
    assert pred.shape == (batch, 1)
    # Tolerance loosened vs. the all-f32 version: the recurrent dots now use bf16
    # operands (f32 accumulation), and state error compounds over T.
    np.testing.assert_allclose(np.asarray(pred), ref, rtol=3e-2, atol=3e-2)

    print("KERNEL_OK")
</pallas_src>

<mosaic_0001>
module attributes {stable_mosaic.version = 11 : i64} {
  func.func @kernel(%arg0: i32, %arg1: memref<8x8x1xf32, #tpu.memory_space<vmem>>, %arg2: memref<1x128xf32, #tpu.memory_space<vmem>>, %arg3: memref<1x128xf32, #tpu.memory_space<vmem>>, %arg4: memref<64x256xbf16, #tpu.memory_space<vmem>>, %arg5: memref<1x128xf32, #tpu.memory_space<vmem>>, %arg6: memref<1x32xf32, #tpu.memory_space<vmem>>, %arg7: memref<1x1xf32, #tpu.memory_space<vmem>>, %arg8: memref<8x1xf32, #tpu.memory_space<vmem>>) attributes {dimension_semantics = [#tpu.dimension_semantics<parallel>], iteration_bounds = array<i64: 1>, scalar_prefetch = 0 : i64, scratch_operands = 0 : i64, tpu.core_type = #tpu.core_type<tc>, window_params = [{transform_indices = @transform_0, window_bounds = array<i64: 8, 8, 1>}, {pipeline_mode = #tpu.pipeline_mode<synchronous>, transform_indices = @transform_1, window_bounds = array<i64: 1, 128>}, {pipeline_mode = #tpu.pipeline_mode<synchronous>, transform_indices = @transform_2, window_bounds = array<i64: 1, 128>}, {pipeline_mode = #tpu.pipeline_mode<synchronous>, transform_indices = @transform_3, window_bounds = array<i64: 64, 256>}, {pipeline_mode = #tpu.pipeline_mode<synchronous>, transform_indices = @transform_4, window_bounds = array<i64: 1, 128>}, {pipeline_mode = #tpu.pipeline_mode<synchronous>, transform_indices = @transform_5, window_bounds = array<i64: 1, 32>}, {pipeline_mode = #tpu.pipeline_mode<synchronous>, transform_indices = @transform_6, window_bounds = array<i64: 1, 1>}, {transform_indices = @transform_7, window_bounds = array<i64: 8, 1>}]} {
    %c0 = arith.constant 0 : index
    %c0_0 = arith.constant 0 : index
    %0 = vector.load %arg2[%c0, %c0_0] : memref<1x128xf32, #tpu.memory_space<vmem>>, vector<1x128xf32>
    %c0_1 = arith.constant 0 : index
    %c0_2 = arith.constant 0 : index
    %1 = vector.load %arg3[%c0_1, %c0_2] : memref<1x128xf32, #tpu.memory_space<vmem>>, vector<1x128xf32>
    %c0_3 = arith.constant 0 : index
    %c0_4 = arith.constant 0 : index
    %2 = vector.load %arg4[%c0_3, %c0_4] : memref<64x256xbf16, #tpu.memory_space<vmem>>, vector<64x256xbf16>
    %c0_5 = arith.constant 0 : index
    %c0_6 = arith.constant 0 : index
    %3 = vector.load %arg5[%c0_5, %c0_6] : memref<1x128xf32, #tpu.memory_space<vmem>>, vector<1x128xf32>
    %cst = arith.constant 0.000000e+00 : f32
    %4 = vector.broadcast %cst : f32 to vector<8x32xf32>
    %cst_7 = arith.constant 0.000000e+00 : f32
    %5 = vector.broadcast %cst_7 : f32 to vector<8x128xf32>
    %c0_i32 = arith.constant 0 : i32
    %6 = arith.index_cast %c0_i32 : i32 to index
    %c0_8 = arith.constant 0 : index
    %c0_9 = arith.constant 0 : index
    %7 = vector.load %arg1[%6, %c0_8, %c0_9] : memref<8x8x1xf32, #tpu.memory_space<vmem>>, vector<1x8x1xf32>
    %8 = vector.shape_cast %7 : vector<1x8x1xf32> to vector<8x1xf32>
    %9 = vector.broadcast %8 : vector<8x1xf32> to vector<8x128xf32>
    %10 = vector.broadcast %0 : vector<1x128xf32> to vector<8x128xf32>
    %11 = arith.mulf %9, %10 : vector<8x128xf32>
    %12 = vector.broadcast %1 : vector<1x128xf32> to vector<8x128xf32>
    %13 = arith.addf %11, %12 : vector<8x128xf32>
    %14 = arith.addf %13, %5 : vector<8x128xf32>
    %15 = arith.negf %14 : vector<8x128xf32>
    %16 = math.exp %15 : vector<8x128xf32>
    %cst_10 = arith.constant 1.000000e+00 : f32
    %17 = vector.broadcast %cst_10 : f32 to vector<8x128xf32>
    %18 = arith.addf %17, %16 : vector<8x128xf32>
    %19 = arith.divf %17, %18 : vector<8x128xf32>
    %20 = math.tanh %14 : vector<8x128xf32>
    %21 = vector.extract_strided_slice %19 {offsets = [0, 0], sizes = [8, 32], strides = [1, 1]} : vector<8x128xf32> to vector<8x32xf32>
    %22 = vector.extract_strided_slice %19 {offsets = [0, 32], sizes = [8, 32], strides = [1, 1]} : vector<8x128xf32> to vector<8x32xf32>
    %23 = vector.extract_strided_slice %20 {offsets = [0, 64], sizes = [8, 32], strides = [1, 1]} : vector<8x128xf32> to vector<8x32xf32>
    %24 = vector.extract_strided_slice %19 {offsets = [0, 96], sizes = [8, 32], strides = [1, 1]} : vector<8x128xf32> to vector<8x32xf32>
    %25 = arith.mulf %22, %4 : vector<8x32xf32>
    %26 = arith.mulf %21, %23 : vector<8x32xf32>
    %27 = arith.addf %25, %26 : vector<8x32xf32>
    %28 = math.tanh %27 : vector<8x32xf32>
    %29 = arith.mulf %24, %28 : vector<8x32xf32>
    %30 = tpu.concatenate %29, %4 in 1 : vector<8x32xf32>, vector<8x32xf32> -> vector<8x64xf32>
    %31 = arith.truncf %30 : vector<8x64xf32> to vector<8x64xbf16>
    %cst_11 = arith.constant dense<0.000000e+00> : vector<8x256xf32>
    %32 = tpu.matmul %31, %2, %cst_11 {dimension_numbers = #tpu.dot_dimension_numbers<[1], [0], [0], [1], [0, 0, 1, 1], [], []>} : vector<8x64xbf16>, vector<64x256xbf16>, vector<8x256xf32> -> vector<8x256xf32>
    %33 = vector.extract_strided_slice %32 {offsets = [0, 0], sizes = [8, 128], strides = [1, 1]} : vector<8x256xf32> to vector<8x128xf32>
    %34 = vector.broadcast %3 : vector<1x128xf32> to vector<8x128xf32>
    %35 = arith.addf %33, %34 : vector<8x128xf32>
    %36 = vector.extract_strided_slice %32 {offsets = [0, 128], sizes = [8, 128], strides = [1, 1]} : vector<8x256xf32> to vector<8x128xf32>
    %37 = arith.negf %35 : vector<8x128xf32>
    %38 = math.exp %37 : vector<8x128xf32>
    %cst_12 = arith.constant 1.000000e+00 : f32
    %39 = vector.broadcast %cst_12 : f32 to vector<8x128xf32>
    %40 = arith.addf %39, %38 : vector<8x128xf32>
    %41 = arith.divf %39, %40 : vector<8x128xf32>
    %42 = math.tanh %35 : vector<8x128xf32>
    %43 = vector.extract_strided_slice %41 {offsets = [0, 0], sizes = [8, 32], strides = [1, 1]} : vector<8x128xf32> to vector<8x32xf32>
    %44 = vector.extract_strided_slice %41 {offsets = [0, 32], sizes = [8, 32], strides = [1, 1]} : vector<8x128xf32> to vector<8x32xf32>
    %45 = vector.extract_strided_slice %42 {offsets = [0, 64], sizes = [8, 32], strides = [1, 1]} : vector<8x128xf32> to vector<8x32xf32>
    %46 = vector.extract_strided_slice %41 {offsets = [0, 96], sizes = [8, 32], strides = [1, 1]} : vector<8x128xf32> to vector<8x32xf32>
    %47 = arith.mulf %44, %4 : vector<8x32xf32>
    %48 = arith.mulf %43, %45 : vector<8x32xf32>
    %49 = arith.addf %47, %48 : vector<8x32xf32>
    %50 = math.tanh %49 : vector<8x32xf32>
    %51 = arith.mulf %46, %50 : vector<8x32xf32>
    %c1_i32 = arith.constant 1 : i32
    %52 = arith.index_cast %c1_i32 : i32 to index
    %c0_13 = arith.constant 0 : index
    %c0_14 = arith.constant 0 : index
    %53 = vector.load %arg1[%52, %c0_13, %c0_14] : memref<8x8x1xf32, #tpu.memory_space<vmem>>, vector<1x8x1xf32>
    %54 = vector.shape_cast %53 : vector<1x8x1xf32> to vector<8x1xf32>
    %55 = vector.broadcast %54 : vector<8x1xf32> to vector<8x128xf32>
    %56 = vector.broadcast %0 : vector<1x128xf32> to vector<8x128xf32>
    %57 = arith.mulf %55, %56 : vector<8x128xf32>
    %58 = vector.broadcast %1 : vector<1x128xf32> to vector<8x128xf32>
    %59 = arith.addf %57, %58 : vector<8x128xf32>
    %60 = arith.addf %59, %36 : vector<8x128xf32>
    %61 = arith.negf %60 : vector<8x128xf32>
    %62 = math.exp %61 : vector<8x128xf32>
    %cst_15 = arith.constant 1.000000e+00 : f32
    %63 = vector.broadcast %cst_15 : f32 to vector<8x128xf32>
    %64 = arith.addf %63, %62 : vector<8x128xf32>
    %65 = arith.divf %63, %64 : vector<8x128xf32>
    %66 = math.tanh %60 : vector<8x128xf32>
    %67 = vector.extract_strided_slice %65 {offsets = [0, 0], sizes = [8, 32], strides = [1, 1]} : vector<8x128xf32> to vector<8x32xf32>
    %68 = vector.extract_strided_slice %65 {offsets = [0, 32], sizes = [8, 32], strides = [1, 1]} : vector<8x128xf32> to vector<8x32xf32>
    %69 = vector.extract_strided_slice %66 {offsets = [0, 64], sizes = [8, 32], strides = [1, 1]} : vector<8x128xf32> to vector<8x32xf32>
    %70 = vector.extract_strided_slice %65 {offsets = [0, 96], sizes = [8, 32], strides = [1, 1]} : vector<8x128xf32> to vector<8x32xf32>
    %71 = arith.mulf %68, %27 : vector<8x32xf32>
    %72 = arith.mulf %67, %69 : vector<8x32xf32>
    %73 = arith.addf %71, %72 : vector<8x32xf32>
    %74 = math.tanh %73 : vector<8x32xf32>
    %75 = arith.mulf %70, %74 : vector<8x32xf32>
    %76 = tpu.concatenate %75, %51 in 1 : vector<8x32xf32>, vector<8x32xf32> -> vector<8x64xf32>
    %77 = arith.truncf %76 : vector<8x64xf32> to vector<8x64xbf16>
    %cst_16 = arith.constant dense<0.000000e+00> : vector<8x256xf32>
    %78 = tpu.matmul %77, %2, %cst_16 {dimension_numbers = #tpu.dot_dimension_numbers<[1], [0], [0], [1], [0, 0, 1, 1], [], []>} : vector<8x64xbf16>, vector<64x256xbf16>, vector<8x256xf32> -> vector<8x256xf32>
    %79 = vector.extract_strided_slice %78 {offsets = [0, 0], sizes = [8, 128], strides = [1, 1]} : vector<8x256xf32> to vector<8x128xf32>
    %80 = vector.broadcast %3 : vector<1x128xf32> to vector<8x128xf32>
    %81 = arith.addf %79, %80 : vector<8x128xf32>
    %82 = vector.extract_strided_slice %78 {offsets = [0, 128], sizes = [8, 128], strides = [1, 1]} : vector<8x256xf32> to vector<8x128xf32>
    %83 = arith.negf %81 : vector<8x128xf32>
    %84 = math.exp %83 : vector<8x128xf32>
    %cst_17 = arith.constant 1.000000e+00 : f32
    %85 = vector.broadcast %cst_17 : f32 to vector<8x128xf32>
    %86 = arith.addf %85, %84 : vector<8x128xf32>
    %87 = arith.divf %85, %86 : vector<8x128xf32>
    %88 = math.tanh %81 : vector<8x128xf32>
    %89 = vector.extract_strided_slice %87 {offsets = [0, 0], sizes = [8, 32], strides = [1, 1]} : vector<8x128xf32> to vector<8x32xf32>
    %90 = vector.extract_strided_slice %87 {offsets = [0, 32], sizes = [8, 32], strides = [1, 1]} : vector<8x128xf32> to vector<8x32xf32>
    %91 = vector.extract_strided_slice %88 {offsets = [0, 64], sizes = [8, 32], strides = [1, 1]} : vector<8x128xf32> to vector<8x32xf32>
    %92 = vector.extract_strided_slice %87 {offsets = [0, 96], sizes = [8, 32], strides = [1, 1]} : vector<8x128xf32> to vector<8x32xf32>
    %93 = arith.mulf %90, %49 : vector<8x32xf32>
    %94 = arith.mulf %89, %91 : vector<8x32xf32>
    %95 = arith.addf %93, %94 : vector<8x32xf32>
    %96 = math.tanh %95 : vector<8x32xf32>
    %97 = arith.mulf %92, %96 : vector<8x32xf32>
    %c2_i32 = arith.constant 2 : i32
    %98 = arith.index_cast %c2_i32 : i32 to index
    %c0_18 = arith.constant 0 : index
    %c0_19 = arith.constant 0 : index
    %99 = vector.load %arg1[%98, %c0_18, %c0_19] : memref<8x8x1xf32, #tpu.memory_space<vmem>>, vector<1x8x1xf32>
    %100 = vector.shape_cast %99 : vector<1x8x1xf32> to vector<8x1xf32>
    %101 = vector.broadcast %100 : vector<8x1xf32> to vector<8x128xf32>
    %102 = vector.broadcast %0 : vector<1x128xf32> to vector<8x128xf32>
    %103 = arith.mulf %101, %102 : vector<8x128xf32>
    %104 = vector.broadcast %1 : vector<1x128xf32> to vector<8x128xf32>
    %105 = arith.addf %103, %104 : vector<8x128xf32>
    %106 = arith.addf %105, %82 : vector<8x128xf32>
    %107 = arith.negf %106 : vector<8x128xf32>
    %108 = math.exp %107 : vector<8x128xf32>
    %cst_20 = arith.constant 1.000000e+00 : f32
    %109 = vector.broadcast %cst_20 : f32 to vector<8x128xf32>
    %110 = arith.addf %109, %108 : vector<8x128xf32>
    %111 = arith.divf %109, %110 : vector<8x128xf32>
    %112 = math.tanh %106 : vector<8x128xf32>
    %113 = vector.extract_strided_slice %111 {offsets = [0, 0], sizes = [8, 32], strides = [1, 1]} : vector<8x128xf32> to vector<8x32xf32>
    %114 = vector.extract_strided_slice %111 {offsets = [0, 32], sizes = [8, 32], strides = [1, 1]} : vector<8x128xf32> to vector<8x32xf32>
    %115 = vector.extract_strided_slice %112 {offsets = [0, 64], sizes = [8, 32], strides = [1, 1]} : vector<8x128xf32> to vector<8x32xf32>
    %116 = vector.extract_strided_slice %111 {offsets = [0, 96], sizes = [8, 32], strides = [1, 1]} : vector<8x128xf32> to vector<8x32xf32>
    %117 = arith.mulf %114, %73 : vector<8x32xf32>
    %118 = arith.mulf %113, %115 : vector<8x32xf32>
    %119 = arith.addf %117, %118 : vector<8x32xf32>
    %120 = math.tanh %119 : vector<8x32xf32>
    %121 = arith.mulf %116, %120 : vector<8x32xf32>
    %122 = tpu.concatenate %121, %97 in 1 : vector<8x32xf32>, vector<8x32xf32> -> vector<8x64xf32>
    %123 = arith.truncf %122 : vector<8x64xf32> to vector<8x64xbf16>
    %cst_21 = arith.constant dense<0.000000e+00> : vector<8x256xf32>
    %124 = tpu.matmul %123, %2, %cst_21 {dimension_numbers = #tpu.dot_dimension_numbers<[1], [0], [0], [1], [0, 0, 1, 1], [], []>} : vector<8x64xbf16>, vector<64x256xbf16>, vector<8x256xf32> -> vector<8x256xf32>
    %125 = vector.extract_strided_slice %124 {offsets = [0, 0], sizes = [8, 128], strides = [1, 1]} : vector<8x256xf32> to vector<8x128xf32>
    %126 = vector.broadcast %3 : vector<1x128xf32> to vector<8x128xf32>
    %127 = arith.addf %125, %126 : vector<8x128xf32>
    %128 = vector.extract_strided_slice %124 {offsets = [0, 128], sizes = [8, 128], strides = [1, 1]} : vector<8x256xf32> to vector<8x128xf32>
    %129 = arith.negf %127 : vector<8x128xf32>
    %130 = math.exp %129 : vector<8x128xf32>
    %cst_22 = arith.constant 1.000000e+00 : f32
    %131 = vector.broadcast %cst_22 : f32 to vector<8x128xf32>
    %132 = arith.addf %131, %130 : vector<8x128xf32>
    %133 = arith.divf %131, %132 : vector<8x128xf32>
    %134 = math.tanh %127 : vector<8x128xf32>
    %135 = vector.extract_strided_slice %133 {offsets = [0, 0], sizes = [8, 32], strides = [1, 1]} : vector<8x128xf32> to vector<8x32xf32>
    %136 = vector.extract_strided_slice %133 {offsets = [0, 32], sizes = [8, 32], strides = [1, 1]} : vector<8x128xf32> to vector<8x32xf32>
    %137 = vector.extract_strided_slice %134 {offsets = [0, 64], sizes = [8, 32], strides = [1, 1]} : vector<8x128xf32> to vector<8x32xf32>
    %138 = vector.extract_strided_slice %133 {offsets = [0, 96], sizes = [8, 32], strides = [1, 1]} : vector<8x128xf32> to vector<8x32xf32>
    %139 = arith.mulf %136, %95 : vector<8x32xf32>
    %140 = arith.mulf %135, %137 : vector<8x32xf32>
    %141 = arith.addf %139, %140 : vector<8x32xf32>
    %142 = math.tanh %141 : vector<8x32xf32>
    %143 = arith.mulf %138, %142 : vector<8x32xf32>
    %c3_i32 = arith.constant 3 : i32
    %144 = arith.index_cast %c3_i32 : i32 to index
    %c0_23 = arith.constant 0 : index
    %c0_24 = arith.constant 0 : index
    %145 = vector.load %arg1[%144, %c0_23, %c0_24] : memref<8x8x1xf32, #tpu.memory_space<vmem>>, vector<1x8x1xf32>
    %146 = vector.shape_cast %145 : vector<1x8x1xf32> to vector<8x1xf32>
    %147 = vector.broadcast %146 : vector<8x1xf32> to vector<8x128xf32>
    %148 = vector.broadcast %0 : vector<1x128xf32> to vector<8x128xf32>
    %149 = arith.mulf %147, %148 : vector<8x128xf32>
    %150 = vector.broadcast %1 : vector<1x128xf32> to vector<8x128xf32>
    %151 = arith.addf %149, %150 : vector<8x128xf32>
    %152 = arith.addf %151, %128 : vector<8x128xf32>
    %153 = arith.negf %152 : vector<8x128xf32>
    %154 = math.exp %153 : vector<8x128xf32>
    %cst_25 = arith.constant 1.000000e+00 : f32
    %155 = vector.broadcast %cst_25 : f32 to vector<8x128xf32>
    %156 = arith.addf %155, %154 : vector<8x128xf32>
    %157 = arith.divf %155, %156 : vector<8x128xf32>
    %158 = math.tanh %152 : vector<8x128xf32>
    %159 = vector.extract_strided_slice %157 {offsets = [0, 0], sizes = [8, 32], strides = [1, 1]} : vector<8x128xf32> to vector<8x32xf32>
    %160 = vector.extract_strided_slice %157 {offsets = [0, 32], sizes = [8, 32], strides = [1, 1]} : vector<8x128xf32> to vector<8x32xf32>
    %161 = vector.extract_strided_slice %158 {offsets = [0, 64], sizes = [8, 32], strides = [1, 1]} : vector<8x128xf32> to vector<8x32xf32>
    %162 = vector.extract_strided_slice %157 {offsets = [0, 96], sizes = [8, 32], strides = [1, 1]} : vector<8x128xf32> to vector<8x32xf32>
    %163 = arith.mulf %160, %119 : vector<8x32xf32>
    %164 = arith.mulf %159, %161 : vector<8x32xf32>
    %165 = arith.addf %163, %164 : vector<8x32xf32>
    %166 = math.tanh %165 : vector<8x32xf32>
    %167 = arith.mulf %162, %166 : vector<8x32xf32>
    %168 = tpu.concatenate %167, %143 in 1 : vector<8x32xf32>, vector<8x32xf32> -> vector<8x64xf32>
    %169 = arith.truncf %168 : vector<8x64xf32> to vector<8x64xbf16>
    %cst_26 = arith.constant dense<0.000000e+00> : vector<8x256xf32>
    %170 = tpu.matmul %169, %2, %cst_26 {dimension_numbers = #tpu.dot_dimension_numbers<[1], [0], [0], [1], [0, 0, 1, 1], [], []>} : vector<8x64xbf16>, vector<64x256xbf16>, vector<8x256xf32> -> vector<8x256xf32>
    %171 = vector.extract_strided_slice %170 {offsets = [0, 0], sizes = [8, 128], strides = [1, 1]} : vector<8x256xf32> to vector<8x128xf32>
    %172 = vector.broadcast %3 : vector<1x128xf32> to vector<8x128xf32>
    %173 = arith.addf %171, %172 : vector<8x128xf32>
    %174 = vector.extract_strided_slice %170 {offsets = [0, 128], sizes = [8, 128], strides = [1, 1]} : vector<8x256xf32> to vector<8x128xf32>
    %175 = arith.negf %173 : vector<8x128xf32>
    %176 = math.exp %175 : vector<8x128xf32>
    %cst_27 = arith.constant 1.000000e+00 : f32
    %177 = vector.broadcast %cst_27 : f32 to vector<8x128xf32>
    %178 = arith.addf %177, %176 : vector<8x128xf32>
    %179 = arith.divf %177, %178 : vector<8x128xf32>
    %180 = math.tanh %173 : vector<8x128xf32>
    %181 = vector.extract_strided_slice %179 {offsets = [0, 0], sizes = [8, 32], strides = [1, 1]} : vector<8x128xf32> to vector<8x32xf32>
    %182 = vector.extract_strided_slice %179 {offsets = [0, 32], sizes = [8, 32], strides = [1, 1]} : vector<8x128xf32> to vector<8x32xf32>
    %183 = vector.extract_strided_slice %180 {offsets = [0, 64], sizes = [8, 32], strides = [1, 1]} : vector<8x128xf32> to vector<8x32xf32>
    %184 = vector.extract_strided_slice %179 {offsets = [0, 96], sizes = [8, 32], strides = [1, 1]} : vector<8x128xf32> to vector<8x32xf32>
    %185 = arith.mulf %182, %141 : vector<8x32xf32>
    %186 = arith.mulf %181, %183 : vector<8x32xf32>
    %187 = arith.addf %185, %186 : vector<8x32xf32>
    %188 = math.tanh %187 : vector<8x32xf32>
    %189 = arith.mulf %184, %188 : vector<8x32xf32>
    %c4_i32 = arith.constant 4 : i32
    %190 = arith.index_cast %c4_i32 : i32 to index
    %c0_28 = arith.constant 0 : index
    %c0_29 = arith.constant 0 : index
    %191 = vector.load %arg1[%190, %c0_28, %c0_29] : memref<8x8x1xf32, #tpu.memory_space<vmem>>, vector<1x8x1xf32>
    %192 = vector.shape_cast %191 : vector<1x8x1xf32> to vector<8x1xf32>
    %193 = vector.broadcast %192 : vector<8x1xf32> to vector<8x128xf32>
    %194 = vector.broadcast %0 : vector<1x128xf32> to vector<8x128xf32>
    %195 = arith.mulf %193, %194 : vector<8x128xf32>
    %196 = vector.broadcast %1 : vector<1x128xf32> to vector<8x128xf32>
    %197 = arith.addf %195, %196 : vector<8x128xf32>
    %198 = arith.addf %197, %174 : vector<8x128xf32>
    %199 = arith.negf %198 : vector<8x128xf32>
    %200 = math.exp %199 : vector<8x128xf32>
    %cst_30 = arith.constant 1.000000e+00 : f32
    %201 = vector.broadcast %cst_30 : f32 to vector<8x128xf32>
    %202 = arith.addf %201, %200 : vector<8x128xf32>
    %203 = arith.divf %201, %202 : vector<8x128xf32>
    %204 = math.tanh %198 : vector<8x128xf32>
    %205 = vector.extract_strided_slice %203 {offsets = [0, 0], sizes = [8, 32], strides = [1, 1]} : vector<8x128xf32> to vector<8x32xf32>
    %206 = vector.extract_strided_slice %203 {offsets = [0, 32], sizes = [8, 32], strides = [1, 1]} : vector<8x128xf32> to vector<8x32xf32>
    %207 = vector.extract_strided_slice %204 {offsets = [0, 64], sizes = [8, 32], strides = [1, 1]} : vector<8x128xf32> to vector<8x32xf32>
    %208 = vector.extract_strided_slice %203 {offsets = [0, 96], sizes = [8, 32], strides = [1, 1]} : vector<8x128xf32> to vector<8x32xf32>
    %209 = arith.mulf %206, %165 : vector<8x32xf32>
    %210 = arith.mulf %205, %207 : vector<8x32xf32>
    %211 = arith.addf %209, %210 : vector<8x32xf32>
    %212 = math.tanh %211 : vector<8x32xf32>
    %213 = arith.mulf %208, %212 : vector<8x32xf32>
    %214 = tpu.concatenate %213, %189 in 1 : vector<8x32xf32>, vector<8x32xf32> -> vector<8x64xf32>
    %215 = arith.truncf %214 : vector<8x64xf32> to vector<8x64xbf16>
    %cst_31 = arith.constant dense<0.000000e+00> : vector<8x256xf32>
    %216 = tpu.matmul %215, %2, %cst_31 {dimension_numbers = #tpu.dot_dimension_numbers<[1], [0], [0], [1], [0, 0, 1, 1], [], []>} : vector<8x64xbf16>, vector<64x256xbf16>, vector<8x256xf32> -> vector<8x256xf32>
    %217 = vector.extract_strided_slice %216 {offsets = [0, 0], sizes = [8, 128], strides = [1, 1]} : vector<8x256xf32> to vector<8x128xf32>
    %218 = vector.broadcast %3 : vector<1x128xf32> to vector<8x128xf32>
    %219 = arith.addf %217, %218 : vector<8x128xf32>
    %220 = vector.extract_strided_slice %216 {offsets = [0, 128], sizes = [8, 128], strides = [1, 1]} : vector<8x256xf32> to vector<8x128xf32>
    %221 = arith.negf %219 : vector<8x128xf32>
    %222 = math.exp %221 : vector<8x128xf32>
    %cst_32 = arith.constant 1.000000e+00 : f32
    %223 = vector.broadcast %cst_32 : f32 to vector<8x128xf32>
    %224 = arith.addf %223, %222 : vector<8x128xf32>
    %225 = arith.divf %223, %224 : vector<8x128xf32>
    %226 = math.tanh %219 : vector<8x128xf32>
    %227 = vector.extract_strided_slice %225 {offsets = [0, 0], sizes = [8, 32], strides = [1, 1]} : vector<8x128xf32> to vector<8x32xf32>
    %228 = vector.extract_strided_slice %225 {offsets = [0, 32], sizes = [8, 32], strides = [1, 1]} : vector<8x128xf32> to vector<8x32xf32>
    %229 = vector.extract_strided_slice %226 {offsets = [0, 64], sizes = [8, 32], strides = [1, 1]} : vector<8x128xf32> to vector<8x32xf32>
    %230 = vector.extract_strided_slice %225 {offsets = [0, 96], sizes = [8, 32], strides = [1, 1]} : vector<8x128xf32> to vector<8x32xf32>
    %231 = arith.mulf %228, %187 : vector<8x32xf32>
    %232 = arith.mulf %227, %229 : vector<8x32xf32>
    %233 = arith.addf %231, %232 : vector<8x32xf32>
    %234 = math.tanh %233 : vector<8x32xf32>
    %235 = arith.mulf %230, %234 : vector<8x32xf32>
    %c5_i32 = arith.constant 5 : i32
    %236 = arith.index_cast %c5_i32 : i32 to index
    %c0_33 = arith.constant 0 : index
    %c0_34 = arith.constant 0 : index
    %237 = vector.load %arg1[%236, %c0_33, %c0_34] : memref<8x8x1xf32, #tpu.memory_space<vmem>>, vector<1x8x1xf32>
    %238 = vector.shape_cast %237 : vector<1x8x1xf32> to vector<8x1xf32>
    %239 = vector.broadcast %238 : vector<8x1xf32> to vector<8x128xf32>
    %240 = vector.broadcast %0 : vector<1x128xf32> to vector<8x128xf32>
    %241 = arith.mulf %239, %240 : vector<8x128xf32>
    %242 = vector.broadcast %1 : vector<1x128xf32> to vector<8x128xf32>
    %243 = arith.addf %241, %242 : vector<8x128xf32>
    %244 = arith.addf %243, %220 : vector<8x128xf32>
    %245 = arith.negf %244 : vector<8x128xf32>
    %246 = math.exp %245 : vector<8x128xf32>
    %cst_35 = arith.constant 1.000000e+00 : f32
    %247 = vector.broadcast %cst_35 : f32 to vector<8x128xf32>
    %248 = arith.addf %247, %246 : vector<8x128xf32>
    %249 = arith.divf %247, %248 : vector<8x128xf32>
    %250 = math.tanh %244 : vector<8x128xf32>
    %251 = vector.extract_strided_slice %249 {offsets = [0, 0], sizes = [8, 32], strides = [1, 1]} : vector<8x128xf32> to vector<8x32xf32>
    %252 = vector.extract_strided_slice %249 {offsets = [0, 32], sizes = [8, 32], strides = [1, 1]} : vector<8x128xf32> to vector<8x32xf32>
    %253 = vector.extract_strided_slice %250 {offsets = [0, 64], sizes = [8, 32], strides = [1, 1]} : vector<8x128xf32> to vector<8x32xf32>
    %254 = vector.extract_strided_slice %249 {offsets = [0, 96], sizes = [8, 32], strides = [1, 1]} : vector<8x128xf32> to vector<8x32xf32>
    %255 = arith.mulf %252, %211 : vector<8x32xf32>
    %256 = arith.mulf %251, %253 : vector<8x32xf32>
    %257 = arith.addf %255, %256 : vector<8x32xf32>
    %258 = math.tanh %257 : vector<8x32xf32>
    %259 = arith.mulf %254, %258 : vector<8x32xf32>
    %260 = tpu.concatenate %259, %235 in 1 : vector<8x32xf32>, vector<8x32xf32> -> vector<8x64xf32>
    %261 = arith.truncf %260 : vector<8x64xf32> to vector<8x64xbf16>
    %cst_36 = arith.constant dense<0.000000e+00> : vector<8x256xf32>
    %262 = tpu.matmul %261, %2, %cst_36 {dimension_numbers = #tpu.dot_dimension_numbers<[1], [0], [0], [1], [0, 0, 1, 1], [], []>} : vector<8x64xbf16>, vector<64x256xbf16>, vector<8x256xf32> -> vector<8x256xf32>
    %263 = vector.extract_strided_slice %262 {offsets = [0, 0], sizes = [8, 128], strides = [1, 1]} : vector<8x256xf32> to vector<8x128xf32>
    %264 = vector.broadcast %3 : vector<1x128xf32> to vector<8x128xf32>
    %265 = arith.addf %263, %264 : vector<8x128xf32>
    %266 = vector.extract_strided_slice %262 {offsets = [0, 128], sizes = [8, 128], strides = [1, 1]} : vector<8x256xf32> to vector<8x128xf32>
    %267 = arith.negf %265 : vector<8x128xf32>
    %268 = math.exp %267 : vector<8x128xf32>
    %cst_37 = arith.constant 1.000000e+00 : f32
    %269 = vector.broadcast %cst_37 : f32 to vector<8x128xf32>
    %270 = arith.addf %269, %268 : vector<8x128xf32>
    %271 = arith.divf %269, %270 : vector<8x128xf32>
    %272 = math.tanh %265 : vector<8x128xf32>
    %273 = vector.extract_strided_slice %271 {offsets = [0, 0], sizes = [8, 32], strides = [1, 1]} : vector<8x128xf32> to vector<8x32xf32>
    %274 = vector.extract_strided_slice %271 {offsets = [0, 32], sizes = [8, 32], strides = [1, 1]} : vector<8x128xf32> to vector<8x32xf32>
    %275 = vector.extract_strided_slice %272 {offsets = [0, 64], sizes = [8, 32], strides = [1, 1]} : vector<8x128xf32> to vector<8x32xf32>
    %276 = vector.extract_strided_slice %271 {offsets = [0, 96], sizes = [8, 32], strides = [1, 1]} : vector<8x128xf32> to vector<8x32xf32>
    %277 = arith.mulf %274, %233 : vector<8x32xf32>
    %278 = arith.mulf %273, %275 : vector<8x32xf32>
    %279 = arith.addf %277, %278 : vector<8x32xf32>
    %280 = math.tanh %279 : vector<8x32xf32>
    %281 = arith.mulf %276, %280 : vector<8x32xf32>
    %c6_i32 = arith.constant 6 : i32
    %282 = arith.index_cast %c6_i32 : i32 to index
    %c0_38 = arith.constant 0 : index
    %c0_39 = arith.constant 0 : index
    %283 = vector.load %arg1[%282, %c0_38, %c0_39] : memref<8x8x1xf32, #tpu.memory_space<vmem>>, vector<1x8x1xf32>
    %284 = vector.shape_cast %283 : vector<1x8x1xf32> to vector<8x1xf32>
    %285 = vector.broadcast %284 : vector<8x1xf32> to vector<8x128xf32>
    %286 = vector.broadcast %0 : vector<1x128xf32> to vector<8x128xf32>
    %287 = arith.mulf %285, %286 : vector<8x128xf32>
    %288 = vector.broadcast %1 : vector<1x128xf32> to vector<8x128xf32>
    %289 = arith.addf %287, %288 : vector<8x128xf32>
    %290 = arith.addf %289, %266 : vector<8x128xf32>
    %291 = arith.negf %290 : vector<8x128xf32>
    %292 = math.exp %291 : vector<8x128xf32>
    %cst_40 = arith.constant 1.000000e+00 : f32
    %293 = vector.broadcast %cst_40 : f32 to vector<8x128xf32>
    %294 = arith.addf %293, %292 : vector<8x128xf32>
    %295 = arith.divf %293, %294 : vector<8x128xf32>
    %296 = math.tanh %290 : vector<8x128xf32>
    %297 = vector.extract_strided_slice %295 {offsets = [0, 0], sizes = [8, 32], strides = [1, 1]} : vector<8x128xf32> to vector<8x32xf32>
    %298 = vector.extract_strided_slice %295 {offsets = [0, 32], sizes = [8, 32], strides = [1, 1]} : vector<8x128xf32> to vector<8x32xf32>
    %299 = vector.extract_strided_slice %296 {offsets = [0, 64], sizes = [8, 32], strides = [1, 1]} : vector<8x128xf32> to vector<8x32xf32>
    %300 = vector.extract_strided_slice %295 {offsets = [0, 96], sizes = [8, 32], strides = [1, 1]} : vector<8x128xf32> to vector<8x32xf32>
    %301 = arith.mulf %298, %257 : vector<8x32xf32>
    %302 = arith.mulf %297, %299 : vector<8x32xf32>
    %303 = arith.addf %301, %302 : vector<8x32xf32>
    %304 = math.tanh %303 : vector<8x32xf32>
    %305 = arith.mulf %300, %304 : vector<8x32xf32>
    %306 = tpu.concatenate %305, %281 in 1 : vector<8x32xf32>, vector<8x32xf32> -> vector<8x64xf32>
    %307 = arith.truncf %306 : vector<8x64xf32> to vector<8x64xbf16>
    %cst_41 = arith.constant dense<0.000000e+00> : vector<8x256xf32>
    %308 = tpu.matmul %307, %2, %cst_41 {dimension_numbers = #tpu.dot_dimension_numbers<[1], [0], [0], [1], [0, 0, 1, 1], [], []>} : vector<8x64xbf16>, vector<64x256xbf16>, vector<8x256xf32> -> vector<8x256xf32>
    %309 = vector.extract_strided_slice %308 {offsets = [0, 0], sizes = [8, 128], strides = [1, 1]} : vector<8x256xf32> to vector<8x128xf32>
    %310 = vector.broadcast %3 : vector<1x128xf32> to vector<8x128xf32>
    %311 = arith.addf %309, %310 : vector<8x128xf32>
    %312 = vector.extract_strided_slice %308 {offsets = [0, 128], sizes = [8, 128], strides = [1, 1]} : vector<8x256xf32> to vector<8x128xf32>
    %313 = arith.negf %311 : vector<8x128xf32>
    %314 = math.exp %313 : vector<8x128xf32>
    %cst_42 = arith.constant 1.000000e+00 : f32
    %315 = vector.broadcast %cst_42 : f32 to vector<8x128xf32>
    %316 = arith.addf %315, %314 : vector<8x128xf32>
    %317 = arith.divf %315, %316 : vector<8x128xf32>
    %318 = math.tanh %311 : vector<8x128xf32>
    %319 = vector.extract_strided_slice %317 {offsets = [0, 0], sizes = [8, 32], strides = [1, 1]} : vector<8x128xf32> to vector<8x32xf32>
    %320 = vector.extract_strided_slice %317 {offsets = [0, 32], sizes = [8, 32], strides = [1, 1]} : vector<8x128xf32> to vector<8x32xf32>
    %321 = vector.extract_strided_slice %318 {offsets = [0, 64], sizes = [8, 32], strides = [1, 1]} : vector<8x128xf32> to vector<8x32xf32>
    %322 = vector.extract_strided_slice %317 {offsets = [0, 96], sizes = [8, 32], strides = [1, 1]} : vector<8x128xf32> to vector<8x32xf32>
    %323 = arith.mulf %320, %279 : vector<8x32xf32>
    %324 = arith.mulf %319, %321 : vector<8x32xf32>
    %325 = arith.addf %323, %324 : vector<8x32xf32>
    %326 = math.tanh %325 : vector<8x32xf32>
    %327 = arith.mulf %322, %326 : vector<8x32xf32>
    %c7_i32 = arith.constant 7 : i32
    %328 = arith.index_cast %c7_i32 : i32 to index
    %c0_43 = arith.constant 0 : index
    %c0_44 = arith.constant 0 : index
    %329 = vector.load %arg1[%328, %c0_43, %c0_44] : memref<8x8x1xf32, #tpu.memory_space<vmem>>, vector<1x8x1xf32>
    %330 = vector.shape_cast %329 : vector<1x8x1xf32> to vector<8x1xf32>
    %331 = vector.broadcast %330 : vector<8x1xf32> to vector<8x128xf32>
    %332 = vector.broadcast %0 : vector<1x128xf32> to vector<8x128xf32>
    %333 = arith.mulf %331, %332 : vector<8x128xf32>
    %334 = vector.broadcast %1 : vector<1x128xf32> to vector<8x128xf32>
    %335 = arith.addf %333, %334 : vector<8x128xf32>
    %336 = arith.addf %335, %312 : vector<8x128xf32>
    %337 = arith.negf %336 : vector<8x128xf32>
    %338 = math.exp %337 : vector<8x128xf32>
    %cst_45 = arith.constant 1.000000e+00 : f32
    %339 = vector.broadcast %cst_45 : f32 to vector<8x128xf32>
    %340 = arith.addf %339, %338 : vector<8x128xf32>
    %341 = arith.divf %339, %340 : vector<8x128xf32>
    %342 = math.tanh %336 : vector<8x128xf32>
    %343 = vector.extract_strided_slice %341 {offsets = [0, 0], sizes = [8, 32], strides = [1, 1]} : vector<8x128xf32> to vector<8x32xf32>
    %344 = vector.extract_strided_slice %341 {offsets = [0, 32], sizes = [8, 32], strides = [1, 1]} : vector<8x128xf32> to vector<8x32xf32>
    %345 = vector.extract_strided_slice %342 {offsets = [0, 64], sizes = [8, 32], strides = [1, 1]} : vector<8x128xf32> to vector<8x32xf32>
    %346 = vector.extract_strided_slice %341 {offsets = [0, 96], sizes = [8, 32], strides = [1, 1]} : vector<8x128xf32> to vector<8x32xf32>
    %347 = arith.mulf %344, %303 : vector<8x32xf32>
    %348 = arith.mulf %343, %345 : vector<8x32xf32>
    %349 = arith.addf %347, %348 : vector<8x32xf32>
    %350 = math.tanh %349 : vector<8x32xf32>
    %351 = arith.mulf %346, %350 : vector<8x32xf32>
    %352 = tpu.concatenate %351, %327 in 1 : vector<8x32xf32>, vector<8x32xf32> -> vector<8x64xf32>
    %353 = arith.truncf %352 : vector<8x64xf32> to vector<8x64xbf16>
    %cst_46 = arith.constant dense<0.000000e+00> : vector<8x256xf32>
    %354 = tpu.matmul %353, %2, %cst_46 {dimension_numbers = #tpu.dot_dimension_numbers<[1], [0], [0], [1], [0, 0, 1, 1], [], []>} : vector<8x64xbf16>, vector<64x256xbf16>, vector<8x256xf32> -> vector<8x256xf32>
    %355 = vector.extract_strided_slice %354 {offsets = [0, 0], sizes = [8, 128], strides = [1, 1]} : vector<8x256xf32> to vector<8x128xf32>
    %356 = vector.broadcast %3 : vector<1x128xf32> to vector<8x128xf32>
    %357 = arith.addf %355, %356 : vector<8x128xf32>
    %358 = vector.extract_strided_slice %354 {offsets = [0, 128], sizes = [8, 128], strides = [1, 1]} : vector<8x256xf32> to vector<8x128xf32>
    %359 = arith.negf %357 : vector<8x128xf32>
    %360 = math.exp %359 : vector<8x128xf32>
    %cst_47 = arith.constant 1.000000e+00 : f32
    %361 = vector.broadcast %cst_47 : f32 to vector<8x128xf32>
    %362 = arith.addf %361, %360 : vector<8x128xf32>
    %363 = arith.divf %361, %362 : vector<8x128xf32>
    %364 = math.tanh %357 : vector<8x128xf32>
    %365 = vector.extract_strided_slice %363 {offsets = [0, 0], sizes = [8, 32], strides = [1, 1]} : vector<8x128xf32> to vector<8x32xf32>
    %366 = vector.extract_strided_slice %363 {offsets = [0, 32], sizes = [8, 32], strides = [1, 1]} : vector<8x128xf32> to vector<8x32xf32>
    %367 = vector.extract_strided_slice %364 {offsets = [0, 64], sizes = [8, 32], strides = [1, 1]} : vector<8x128xf32> to vector<8x32xf32>
    %368 = vector.extract_strided_slice %363 {offsets = [0, 96], sizes = [8, 32], strides = [1, 1]} : vector<8x128xf32> to vector<8x32xf32>
    %369 = arith.mulf %366, %325 : vector<8x32xf32>
    %370 = arith.mulf %365, %367 : vector<8x32xf32>
    %371 = arith.addf %369, %370 : vector<8x32xf32>
    %372 = math.tanh %371 : vector<8x32xf32>
    %373 = arith.mulf %368, %372 : vector<8x32xf32>
    %c8_i32 = arith.constant 8 : i32
    %c0_48 = arith.constant 0 : index
    %c0_49 = arith.constant 0 : index
    %374 = vector.load %arg6[%c0_48, %c0_49] : memref<1x32xf32, #tpu.memory_space<vmem>>, vector<1x32xf32>
    %375 = vector.broadcast %374 : vector<1x32xf32> to vector<8x32xf32>
    %376 = arith.mulf %373, %375 : vector<8x32xf32>
    %cst_50 = arith.constant dense<0.000000e+00> : vector<8xf32>
    %377 = vector.multi_reduction <add>, %376, %cst_50 [1] : vector<8x32xf32> to vector<8xf32>
    %378 = vector.shape_cast %377 : vector<8xf32> to vector<8x1xf32>
    %c0_51 = arith.constant 0 : index
    %c0_52 = arith.constant 0 : index
    %379 = vector.load %arg7[%c0_51, %c0_52] : memref<1x1xf32, #tpu.memory_space<vmem>>, vector<1x1xf32>
    %380 = vector.broadcast %379 : vector<1x1xf32> to vector<8x1xf32>
    %381 = arith.addf %378, %380 : vector<8x1xf32>
    %c0_53 = arith.constant 0 : index
    %c0_54 = arith.constant 0 : index
    %382 = vector.load %arg8[%c0_53, %c0_54] : memref<8x1xf32, #tpu.memory_space<vmem>>, vector<8x1xf32>
    tpu.vector_store %arg8[%c0_53, %c0_54], %381 {strides = array<i32>} : memref<8x1xf32, #tpu.memory_space<vmem>>, vector<8x1xf32>,
    return
  }
  func.func @transform_0(%arg0: i32) -> (i32, i32, i32) {
    %c0_i32 = arith.constant 0 : i32
    %c0_i32_0 = arith.constant 0 : i32
    %c0_i32_1 = arith.constant 0 : i32
    return %c0_i32, %arg0, %c0_i32_0 : i32, i32, i32
  }
  func.func @transform_1(%arg0: i32) -> (i32, i32) {
    %c0_i32 = arith.constant 0 : i32
    %c0_i32_0 = arith.constant 0 : i32
    %c0_i32_1 = arith.constant 0 : i32
    return %c0_i32, %c0_i32_0 : i32, i32
  }
  func.func @transform_2(%arg0: i32) -> (i32, i32) {
    %c0_i32 = arith.constant 0 : i32
    %c0_i32_0 = arith.constant 0 : i32
    %c0_i32_1 = arith.constant 0 : i32
    return %c0_i32, %c0_i32_0 : i32, i32
  }
  func.func @transform_3(%arg0: i32) -> (i32, i32) {
    %c0_i32 = arith.constant 0 : i32
    %c0_i32_0 = arith.constant 0 : i32
    %c0_i32_1 = arith.constant 0 : i32
    return %c0_i32, %c0_i32_0 : i32, i32
  }
  func.func @transform_4(%arg0: i32) -> (i32, i32) {
    %c0_i32 = arith.constant 0 : i32
    %c0_i32_0 = arith.constant 0 : i32
    %c0_i32_1 = arith.constant 0 : i32
    return %c0_i32, %c0_i32_0 : i32, i32
  }
  func.func @transform_5(%arg0: i32) -> (i32, i32) {
    %c0_i32 = arith.constant 0 : i32
    %c0_i32_0 = arith.constant 0 : i32
    %c0_i32_1 = arith.constant 0 : i32
    return %c0_i32, %c0_i32_0 : i32, i32
  }
  func.func @transform_6(%arg0: i32) -> (i32, i32) {
    %c0_i32 = arith.constant 0 : i32
    %c0_i32_0 = arith.constant 0 : i32
    %c0_i32_1 = arith.constant 0 : i32
    return %c0_i32, %c0_i32_0 : i32, i32
  }
  func.func @transform_7(%arg0: i32) -> (i32, i32) {
    %c0_i32 = arith.constant 0 : i32
    %c0_i32_0 = arith.constant 0 : i32
    return %arg0, %c0_i32 : i32, i32
  }
}

</mosaic_0001>

<bundles_post_ra>
// kernel: tpu_custom_call.1
= control target key start
LH: loop header
LB: loop body
LE: loop exit
PB: predicated region body
PF: predicated region fallthrough
CT: control target
= control target key end

     0   :  { %v1310_v0 = vmov 0   ;;  %s1311_s30 = smov 64   ;;  %s1312_s8 = smov 32   ;;  %vm96_vm4 = vcmask 261120   ;;  %vm139_vm5 = vcmask 523264   ;;  %s1705_s0 = inlined_call_operand.vmem [shape: f32[8,8,1], index: 0, kind: input, shape index: {}]   ;;  %s1706_s1 = inlined_call_operand.vmem [shape: f32[1,128], index: 1, kind: input, shape index: {}]   ;;  %s1707_s2 = inlined_call_operand.vmem [shape: f32[1,128], index: 2, kind: input, shape index: {}]   ;;  %s1708_s3 = inlined_call_operand.vmem [shape: bf16[64,256], index: 3, kind: input, shape index: {}]   ;;  %s1709_s4 = inlined_call_operand.vmem [shape: f32[1,128], index: 4, kind: input, shape index: {}]   ;;  %s1710_s5 = inlined_call_operand.vmem [shape: f32[1,32], index: 5, kind: input, shape index: {}]   ;;  %s1711_s6 = inlined_call_operand.<no memory space> [shape: f32[1,1], index: 6, kind: input, shape index: {}]   ;;  %s1712_s7 = inlined_call_operand.vmem [shape: f32[8,1], index: 7, kind: output, shape index: {}]  }
   0x1   :  { %1172 = vset.pattern.permute.xlu0 %v1310_v0  ;;  %v40_v1 = vld [vmem:[%s1705_s0] sm:$0xff]  ;;  %1173 = vset.pattern.permute.xlu2 %v1310_v0  ;;  %v1117_v27 = vld [vmem:[%s1708_s3 + $0x30] sm:$0xf]  ;;  %v1167_v28 = vld [vmem:[%s1708_s3 + $0x34] sm:$0xf0]  ;;  %s1313_s18 = smov 96  }
   0x2   :  { %43 = vperm.xlu0 %1172, %v40_v1   ;;  %v1360_v2 = vld [vmem:[%s1706_s1] ss:$0 sm:$0xff]  ;;  %v1166_v29 = vld [vmem:[%s1708_s3 + $0x34] sm:$0xf]  ;;  %v1384_v30 = vor.u32 %v1167_v28, %v1117_v27  ;;  %v1119_v31 = vld [vmem:[%s1708_s3 + $0x38] sm:$0xf0] }
   0x3   :  { %v1365_v3 = vld [vmem:[%s1707_s2] ss:$0 sm:$0xff]  ;;  %v1165_v33 = vld [vmem:[%s1708_s3 + $0x24] sm:$0xf0]  ;;  %v1395_v34 = vor.u32 %v1166_v29, %v1119_v31  ;;  %v1164_v35 = vld [vmem:[%s1708_s3 + $0x24] sm:$0xf] }
   0x4   :  { %v1109_v32 = vld [vmem:[%s1708_s3 + $0x20] sm:$0xf]  ;;  %v1111_v36 = vld [vmem:[%s1708_s3 + $0x28] sm:$0xf0]  ;;  %147 = vmatpush.bf16.msra.mxu0 %v1384_v30  ;;  %274 = vmatpush.bf16.msra.mxu2 %v1384_v30  ;;  %v1101_v39 = vld [vmem:[%s1708_s3 + $0x10] sm:$0xf] }
   0x5   :  { %v1404_v37 = vor.u32 %v1165_v33, %v1109_v32  ;;  %160 = vmatpush.bf16.msra.mxu1 %v1395_v34  ;;  %v1408_v38 = vor.u32 %v1164_v35, %v1111_v36  ;;  %v1163_v40 = vld [vmem:[%s1708_s3 + $0x14] sm:$0xf0]  ;;  %287 = vmatpush.bf16.msra.mxu3 %v1395_v34  ;;  %v1162_v41 = vld [vmem:[%s1708_s3 + $0x14] sm:$0xf]  ;;  %v1103_v42 = vld [vmem:[%s1708_s3 + $0x18] sm:$0xf0] }
   0x6   :  { %v1424_v43 = vor.u32 %v1163_v40, %v1101_v39  ;;  %v1428_v44 = vor.u32 %v1162_v41, %v1103_v42  ;;  %v1093_v47 = vld [vmem:[%s1708_s3] sm:$0xf]  ;;  %v1161_v48 = vld [vmem:[%s1708_s3 + $0x4] sm:$0xf0]  ;;  %v1160_v49 = vld [vmem:[%s1708_s3 + $0x4] sm:$0xf] }
   0x7   :  { %v1445_v50 = vor.u32 %v1161_v48, %v1093_v47  ;;  %v1095_v51 = vld [vmem:[%s1708_s3 + $0x8] sm:$0xf0]  ;;  %v1490_v59 = vld [vmem:[%s1709_s4] ss:$0 sm:$0xff] }
   0x8   :  { %148 = vmatpush.bf16.msra.mxu0 %v1404_v37  ;;  %275 = vmatpush.bf16.msra.mxu2 %v1404_v37  ;;  %v1450_v52 = vor.u32 %v1160_v49, %v1095_v51  ;;  %v1126_v53 = vld [vmem:[%s1705_s0 + $0x8] sm:$0xff] }
   0x9   :  { %161 = vmatpush.bf16.msra.mxu1 %v1408_v38  ;;  %288 = vmatpush.bf16.msra.mxu3 %v1408_v38 }
   0xc   :  { %149 = vmatpush.bf16.msra.mxu0 %v1424_v43  ;;  %276 = vmatpush.bf16.msra.mxu2 %v1424_v43 }
   0xd   :  { %162 = vmatpush.bf16.msra.mxu1 %v1428_v44  ;;  %289 = vmatpush.bf16.msra.mxu3 %v1428_v44 }
  0x10   :  { %150 = vmatpush.bf16.msra.mxu0 %v1445_v50  ;;  %277 = vmatpush.bf16.msra.mxu2 %v1445_v50 }
  0x11   :  { %163 = vmatpush.bf16.msra.mxu1 %v1450_v52  ;;  %290 = vmatpush.bf16.msra.mxu3 %v1450_v52 }
  0x14   :  { %398 = vmatpush.bf16.msrb.mxu0 %v1384_v30  ;;  %522 = vmatpush.bf16.msrb.mxu2 %v1384_v30 }
  0x15   :  { %411 = vmatpush.bf16.msrb.mxu1 %v1395_v34  ;;  %535 = vmatpush.bf16.msrb.mxu3 %v1395_v34 }
  0x18   :  { %399 = vmatpush.bf16.msrb.mxu0 %v1404_v37  ;;  %523 = vmatpush.bf16.msrb.mxu2 %v1404_v37 }
  0x19   :  { %412 = vmatpush.bf16.msrb.mxu1 %v1408_v38  ;;  %536 = vmatpush.bf16.msrb.mxu3 %v1408_v38 }
  0x1c   :  { %400 = vmatpush.bf16.msrb.mxu0 %v1424_v43  ;;  %524 = vmatpush.bf16.msrb.mxu2 %v1424_v43 }
  0x1d   :  { %413 = vmatpush.bf16.msrb.mxu1 %v1428_v44  ;;  %537 = vmatpush.bf16.msrb.mxu3 %v1428_v44 }
  0x20   :  { %401 = vmatpush.bf16.msrb.mxu0 %v1445_v50  ;;  %525 = vmatpush.bf16.msrb.mxu2 %v1445_v50 }
  0x21   :  { %414 = vmatpush.bf16.msrb.mxu1 %v1450_v52  ;;  %538 = vmatpush.bf16.msrb.mxu3 %v1450_v52 }
  0x74   :  { %v44_v4 = vpop.permute.xlu0 %43 }
  0x75   :  { %v49_v5 = vmul.f32 %v1360_v2, %v44_v4 }
  0x77   :  { %v53_v6 = vadd.f32 %v1365_v3, %v49_v5 }
  0x79   :  { %1179 = vtanh.f32 %v53_v6  ;;  %v1090_v8 = vmul.f32 -1.442695, %v53_v6 }
  0x7b   :  { %1181 = vpow2.f32 %v1090_v8 }
  0x7f   :  { %v1180_v7 = vpop.eup %1179 }
  0x80   :  { %77 = vrot.lane.b32.xlu0 %v1180_v7, %s1311_s30 }
  0x81   :  { %v1182_v9 = vpop.eup %1181 }
  0x82   :  { %v58_v10 = vadd.f32 1.0, %v1182_v9 }
  0x84   :  { %1183 = vrcp.f32 %v58_v10  ;;  %v70_v16 = vand.u32 2147483648, %v58_v10  ;;  %vm64_vm1 = vweird.f32 %v58_v10  ;;  %v68_v17 = vand.u32 2147483647, %v58_v10 }
  0x86   :  { %v71_v19 = vor.u32 1.1754944e-38, %v70_v16  ;;  %vm69_vm3 = vcmp.eq.f32.partialorder %v68_v17, 8.507059e+37 }
  0x8a   :  { %v1184_v11 = vpop.eup %1183 }
  0x8b   :  { %v60_v12 = vmul.f32 %v1184_v11, %v58_v10  ;;  %vm65_vm0 = vweird.f32 %v1184_v11 }
  0x8c   :  { %vm66_vm2 = vmor %vm64_vm1, %vm65_vm0 }
  0x8d   :  { %v61_v13 = vsub.f32 1.0, %v60_v12 }
  0x8f   :  { %v62_v14 = vmul.f32 %v1184_v11, %v61_v13 }
  0x91   :  { %v63_v15 = vadd.f32 %v1184_v11, %v62_v14 }
  0x93   :  { %v67_v18 = vsel %vm66_vm2, %v1184_v11, %v63_v15 }
  0x94   :  { %v72_v21 = vsel %vm69_vm3, %v71_v19, %v67_v18 }
  0x95   :  { %v75_v23 = vmul.f32 0.0, %v72_v21 }
  0xf2   :  { %v78_v20 = vpop.permute.xlu0 %77 }
  0xf3   :  { %v80_v22 = vmul.f32 %v78_v20, %v72_v21 }
  0xf5   :  { %82 = vrot.lane.b32.xlu1 %v80_v22, %s1312_s8 }
 0x167   :  { %v83_v24 = vpop.permute.xlu1 %82 }
 0x168   :  { %v1371_v25 = vadd.f32 %v83_v24, %v75_v23 }
 0x16a   :  { %1185 = vtanh.f32 %v1371_v25 }
 0x170   :  { %v1186_v26 = vpop.eup %1185 }
 0x171   :  { %88 = vrot.lane.b32.xlu1 %v1186_v26, %s1311_s30 }
 0x1e3   :  { %v89_v45 = vpop.permute.xlu1 %88 }
 0x1e4   :  { %v91_v46 = vmul.f32 %v89_v45, %v72_v21 }
 0x1e6   :  { %93 = vrot.lane.b32.xlu2 %v91_v46, %s1312_s8 }
 0x1ee   :  { %214 = vperm.xlu2 %1173, %v1126_v53  }
 0x240   :  { %v94_v54 = vpop.permute.xlu2 %93 }
 0x241   :  { %v97_v55 = vsel %vm96_vm4, %v94_v54, 0.0  ;;  %v1131_v54 = vld [vmem:[%s1705_s0 + $0x10] sm:$0xff] }
 0x242   :  { %v98_v56 = vpack.c.bf16 %v97_v55, %v97_v55 }
 0x244   :  { %1123 = vmatmul.msk.bf16.vlgmr.msra.gmra.mxu0 %vm139_vm5, %v98_v56  ;;  %1124 = vmatmul.msk.bf16.vlgmr.msra.gmra.mxu1 %vm139_vm5, %v98_v56 }
 0x245   :  { %646 = vmatpush.bf16.msra.mxu0 %v1384_v30  ;;  %659 = vmatpush.bf16.msra.mxu1 %v1395_v34 }
 0x248   :  { %v215_v57 = vpop.permute.xlu2 %214 }
 0x249   :  { %647 = vmatpush.bf16.msra.mxu0 %v1404_v37  ;;  %660 = vmatpush.bf16.msra.mxu1 %v1408_v38  ;;  %v217_v58 = vmul.f32 %v1360_v2, %v215_v57 }
 0x24b   :  { %v218_v60 = vadd.f32 %v1365_v3, %v217_v58 }
 0x24d   :  { %648 = vmatpush.bf16.msra.mxu0 %v1424_v43  ;;  %661 = vmatpush.bf16.msra.mxu1 %v1428_v44 }
 0x251   :  { %649 = vmatpush.bf16.msra.mxu0 %v1445_v50  ;;  %662 = vmatpush.bf16.msra.mxu1 %v1450_v52 }
 0x2c1   :  { %v152_v61 = vpop.f32.mrf.mxu0  ;;  %v165_v62 = vpop.f32.mrf.mxu1 }
 0x2c2   :  { %v172_v63 = vadd.f32 %v1490_v59, %v152_v61  ;;  %v219_v0 = vadd.f32 %v218_v60, %v165_v62 }
 0x2c4   :  { %1187 = vtanh.f32 %v172_v63  ;;  %v1125_v7 = vmul.f32 -1.442695, %v172_v63  ;;  %v1127_v8 = vmul.f32 -1.442695, %v219_v0 }
 0x2c5   :  { %1189 = vtanh.f32 %v219_v0 }
 0x2c6   :  { %1191 = vpow2.f32 %v1125_v7 }
 0x2c7   :  { %1193 = vpow2.f32 %v1127_v8 }
 0x2c9   :  { %v154_v1 = vpop.f32.mrf.mxu0  ;;  %v167_v4 = vpop.f32.mrf.mxu1 }
 0x2ca   :  { %v1188_v5 = vpop.eup %1187 }
 0x2cb   :  { %v1190_v6 = vpop.eup %1189  ;;  %195 = vrot.lane.b32.xlu0 %v1188_v5, %s1311_s30 }
 0x2cc   :  { %242 = vrot.lane.b32.xlu1 %v1190_v6, %s1311_s30  ;;  %v1192_v9 = vpop.eup %1191 }
 0x2cd   :  { %v1194_v10 = vpop.eup %1193  ;;  %v176_v11 = vadd.f32 1.0, %v1192_v9 }
 0x2ce   :  { %v223_v12 = vadd.f32 1.0, %v1194_v10 }
 0x2cf   :  { %1195 = vrcp.f32 %v176_v11  ;;  %v188_v22 = vand.u32 2147483648, %v176_v11  ;;  %vm182_vm8 = vweird.f32 %v176_v11  ;;  %v186_v24 = vand.u32 2147483647, %v176_v11 }
 0x2d0   :  { %1197 = vrcp.f32 %v223_v12  ;;  %v235_v26 = vand.u32 2147483648, %v223_v12  ;;  %vm229_vm10 = vweird.f32 %v223_v12  ;;  %v233_v27 = vand.u32 2147483647, %v223_v12 }
 0x2d1   :  { %v189_v29 = vor.u32 1.1754944e-38, %v188_v22  ;;  %vm187_vm12 = vcmp.eq.f32.partialorder %v186_v24, 8.507059e+37 }
 0x2d2   :  { %v236_v32 = vor.u32 1.1754944e-38, %v235_v26  ;;  %vm234_vm13 = vcmp.eq.f32.partialorder %v233_v27, 8.507059e+37 }
 0x2d5   :  { %v1196_v13 = vpop.eup %1195 }
 0x2d6   :  { %v1198_v14 = vpop.eup %1197  ;;  %v178_v15 = vmul.f32 %v1196_v13, %v176_v11  ;;  %vm183_vm6 = vweird.f32 %v1196_v13 }
 0x2d7   :  { %v225_v16 = vmul.f32 %v1198_v14, %v223_v12  ;;  %vm230_vm7 = vweird.f32 %v1198_v14  ;;  %vm184_vm9 = vmor %vm182_vm8, %vm183_vm6 }
 0x2d8   :  { %v179_v17 = vsub.f32 1.0, %v178_v15  ;;  %vm231_vm11 = vmor %vm229_vm10, %vm230_vm7 }
 0x2d9   :  { %v226_v18 = vsub.f32 1.0, %v225_v16 }
 0x2da   :  { %v180_v19 = vmul.f32 %v1196_v13, %v179_v17 }
 0x2db   :  { %v227_v20 = vmul.f32 %v1198_v14, %v226_v18 }
 0x2dc   :  { %v181_v21 = vadd.f32 %v1196_v13, %v180_v19 }
 0x2dd   :  { %v228_v23 = vadd.f32 %v1198_v14, %v227_v20 }
 0x2de   :  { %v185_v28 = vsel %vm184_vm9, %v1196_v13, %v181_v21 }
 0x2df   :  { %v232_v31 = vsel %vm231_vm11, %v1198_v14, %v228_v23  ;;  %v190_v35 = vsel %vm187_vm12, %v189_v29, %v185_v28 }
 0x2e0   :  { %v237_v40 = vsel %vm234_vm13, %v236_v32, %v232_v31  ;;  %v193_v42 = vmul.f32 0.0, %v190_v35 }
 0x2e1   :  { %v240_v48 = vmul.f32 %v237_v40, %v1371_v25 }
 0x33d   :  { %v196_v33 = vpop.permute.xlu0 %195 }
 0x33e   :  { %v198_v36 = vmul.f32 %v196_v33, %v190_v35  ;;  %v243_v39 = vpop.permute.xlu1 %242 }
 0x33f   :  { %v245_v41 = vmul.f32 %v243_v39, %v237_v40 }
 0x340   :  { %200 = vrot.lane.b32.xlu2 %v198_v36, %s1312_s8 }
 0x341   :  { %247 = vrot.lane.b32.xlu0 %v245_v41, %s1312_s8 }
 0x39a   :  { %v201_v45 = vpop.permute.xlu2 %200 }
 0x39b   :  { %v1498_v46 = vadd.f32 %v201_v45, %v193_v42 }
 0x39d   :  { %1199 = vtanh.f32 %v1498_v46 }
 0x3a3   :  { %v1200_v47 = vpop.eup %1199 }
 0x3a4   :  { %206 = vrot.lane.b32.xlu1 %v1200_v47, %s1311_s30 }
 0x3b3   :  { %v248_v49 = vpop.permute.xlu0 %247 }
 0x3b4   :  { %v1503_v51 = vadd.f32 %v248_v49, %v240_v48 }
 0x3b6   :  { %1201 = vtanh.f32 %v1503_v51 }
 0x3bc   :  { %v1202_v53 = vpop.eup %1201 }
 0x3bd   :  { %253 = vrot.lane.b32.xlu2 %v1202_v53, %s1311_s30 }
 0x3c5   :  { %338 = vperm.xlu2 %1173, %v1131_v54  }
 0x416   :  { %v207_v55 = vpop.permute.xlu1 %206 }
 0x417   :  { %v209_v56 = vmul.f32 %v207_v55, %v190_v35  ;;  %v254_v57 = vpop.permute.xlu2 %253 }
 0x418   :  { %v256_v58 = vmul.f32 %v254_v57, %v237_v40 }
 0x419   :  { %262 = vrot.lane.b32.xlu1 %v209_v56, %s1311_s30 }
 0x41a   :  { %258 = vrot.lane.b32.xlu0 %v256_v58, %s1312_s8 }
 0x41f   :  { %v339_v63 = vpop.permute.xlu2 %338 }
 0x420   :  { %v341_v0 = vmul.f32 %v1360_v2, %v339_v63 }
 0x422   :  { %v342_v1 = vadd.f32 %v1365_v3, %v341_v0 }
 0x48b   :  { %v263_v25 = vpop.permute.xlu1 %262 }
 0x48c   :  { %v259_v60 = vpop.permute.xlu0 %258 }
 0x48d   :  { %v265_v61 = vsel %vm96_vm4, %v259_v60, %v263_v25 }
 0x48e   :  { %v266_v62 = vpack.c.bf16 %v265_v61, %v265_v61 }
 0x490   :  { %1128 = vmatmul.msk.bf16.vlgmr.msra.gmra.mxu2 %vm139_vm5, %v266_v62  ;;  %1129 = vmatmul.msk.bf16.vlgmr.msra.gmra.mxu3 %vm139_vm5, %v266_v62 }
 0x491   :  { %770 = vmatpush.bf16.msra.mxu2 %v1384_v30  ;;  %783 = vmatpush.bf16.msra.mxu3 %v1395_v34 }
 0x495   :  { %771 = vmatpush.bf16.msra.mxu2 %v1404_v37  ;;  %784 = vmatpush.bf16.msra.mxu3 %v1408_v38 }
 0x499   :  { %772 = vmatpush.bf16.msra.mxu2 %v1424_v43  ;;  %785 = vmatpush.bf16.msra.mxu3 %v1428_v44 }
 0x49d   :  { %773 = vmatpush.bf16.msra.mxu2 %v1445_v50  ;;  %786 = vmatpush.bf16.msra.mxu3 %v1450_v52 }
 0x513   :  { %v279_v4 = vpop.f32.mrf.mxu2  ;;  %v292_v5 = vpop.f32.mrf.mxu3 }
 0x514   :  { %v296_v6 = vadd.f32 %v1490_v59, %v279_v4  ;;  %v343_v7 = vadd.f32 %v342_v1, %v292_v5 }
 0x516   :  { %1203 = vtanh.f32 %v296_v6  ;;  %v1130_v12 = vmul.f32 -1.442695, %v296_v6  ;;  %v1132_v13 = vmul.f32 -1.442695, %v343_v7 }
 0x517   :  { %1205 = vtanh.f32 %v343_v7 }
 0x518   :  { %1207 = vpow2.f32 %v1130_v12 }
 0x519   :  { %1209 = vpow2.f32 %v1132_v13 }
 0x51b   :  { %v281_v8 = vpop.f32.mrf.mxu2  ;;  %v294_v9 = vpop.f32.mrf.mxu3 }
 0x51c   :  { %v1204_v10 = vpop.eup %1203 }
 0x51d   :  { %v1206_v11 = vpop.eup %1205  ;;  %319 = vrot.lane.b32.xlu0 %v1204_v10, %s1311_s30 }
 0x51e   :  { %366 = vrot.lane.b32.xlu1 %v1206_v11, %s1311_s30  ;;  %v1208_v14 = vpop.eup %1207 }
 0x51f   :  { %v1210_v15 = vpop.eup %1209  ;;  %v300_v16 = vadd.f32 1.0, %v1208_v14 }
 0x520   :  { %v347_v17 = vadd.f32 1.0, %v1210_v15 }
 0x521   :  { %1211 = vrcp.f32 %v300_v16  ;;  %v312_v28 = vand.u32 2147483648, %v300_v16  ;;  %vm306_vm0 = vweird.f32 %v300_v16  ;;  %v310_v31 = vand.u32 2147483647, %v300_v16 }
 0x522   :  { %1213 = vrcp.f32 %v347_v17  ;;  %v359_v32 = vand.u32 2147483648, %v347_v17  ;;  %vm353_vm2 = vweird.f32 %v347_v17  ;;  %v357_v33 = vand.u32 2147483647, %v347_v17 }
 0x523   :  { %v313_v36 = vor.u32 1.1754944e-38, %v312_v28  ;;  %vm311_vm6 = vcmp.eq.f32.partialorder %v310_v31, 8.507059e+37 }
 0x524   :  { %v360_v40 = vor.u32 1.1754944e-38, %v359_v32  ;;  %vm358_vm7 = vcmp.eq.f32.partialorder %v357_v33, 8.507059e+37 }
 0x527   :  { %v1212_v18 = vpop.eup %1211 }
 0x528   :  { %v1214_v19 = vpop.eup %1213  ;;  %v302_v20 = vmul.f32 %v1212_v18, %v300_v16  ;;  %vm307_vm14 = vweird.f32 %v1212_v18 }
 0x529   :  { %v349_v21 = vmul.f32 %v1214_v19, %v347_v17  ;;  %vm354_vm15 = vweird.f32 %v1214_v19  ;;  %vm308_vm1 = vmor %vm306_vm0, %vm307_vm14 }
 0x52a   :  { %v303_v22 = vsub.f32 1.0, %v302_v20  ;;  %vm355_vm3 = vmor %vm353_vm2, %vm354_vm15 }
 0x52b   :  { %v350_v23 = vsub.f32 1.0, %v349_v21 }
 0x52c   :  { %v304_v24 = vmul.f32 %v1212_v18, %v303_v22 }
 0x52d   :  { %v351_v26 = vmul.f32 %v1214_v19, %v350_v23 }
 0x52e   :  { %v305_v27 = vadd.f32 %v1212_v18, %v304_v24 }
 0x52f   :  { %v352_v29 = vadd.f32 %v1214_v19, %v351_v26 }
 0x530   :  { %v309_v35 = vsel %vm308_vm1, %v1212_v18, %v305_v27 }
 0x531   :  { %v356_v39 = vsel %vm355_vm3, %v1214_v19, %v352_v29  ;;  %v314_v42 = vsel %vm311_vm6, %v313_v36, %v309_v35 }
 0x532   :  { %v361_v48 = vsel %vm358_vm7, %v360_v40, %v356_v39  ;;  %v317_v53 = vmul.f32 %v314_v42, %v1498_v46  ;;  %v1136_v46 = vld [vmem:[%s1705_s0 + $0x18] sm:$0xff] }
 0x533   :  { %v364_v57 = vmul.f32 %v361_v48, %v1503_v51 }
 0x58f   :  { %v320_v41 = vpop.permute.xlu0 %319 }
 0x590   :  { %v322_v45 = vmul.f32 %v320_v41, %v314_v42  ;;  %v367_v47 = vpop.permute.xlu1 %366 }
 0x591   :  { %v369_v49 = vmul.f32 %v367_v47, %v361_v48 }
 0x592   :  { %324 = vrot.lane.b32.xlu2 %v322_v45, %s1312_s8 }
 0x593   :  { %371 = vrot.lane.b32.xlu0 %v369_v49, %s1312_s8 }
 0x5ec   :  { %v325_v54 = vpop.permute.xlu2 %324 }
 0x5ed   :  { %v1531_v55 = vadd.f32 %v325_v54, %v317_v53 }
 0x5ef   :  { %1215 = vtanh.f32 %v1531_v55 }
 0x5f5   :  { %v1216_v56 = vpop.eup %1215 }
 0x5f6   :  { %330 = vrot.lane.b32.xlu1 %v1216_v56, %s1311_s30 }
 0x605   :  { %v372_v58 = vpop.permute.xlu0 %371 }
 0x606   :  { %v1536_v25 = vadd.f32 %v372_v58, %v364_v57 }
 0x608   :  { %1217 = vtanh.f32 %v1536_v25 }
 0x60e   :  { %v1218_v60 = vpop.eup %1217 }
 0x60f   :  { %377 = vrot.lane.b32.xlu2 %v1218_v60, %s1311_s30 }
 0x617   :  { %462 = vperm.xlu2 %1173, %v1136_v46  }
 0x668   :  { %v331_v61 = vpop.permute.xlu1 %330 }
 0x669   :  { %v333_v62 = vmul.f32 %v331_v61, %v314_v42  ;;  %v378_v63 = vpop.permute.xlu2 %377 }
 0x66a   :  { %v380_v0 = vmul.f32 %v378_v63, %v361_v48 }
 0x66b   :  { %386 = vrot.lane.b32.xlu1 %v333_v62, %s1311_s30 }
 0x66c   :  { %382 = vrot.lane.b32.xlu0 %v380_v0, %s1312_s8 }
 0x671   :  { %v463_v6 = vpop.permute.xlu2 %462 }
 0x672   :  { %v465_v7 = vmul.f32 %v1360_v2, %v463_v6 }
 0x674   :  { %v466_v8 = vadd.f32 %v1365_v3, %v465_v7 }
 0x6dd   :  { %v387_v51 = vpop.permute.xlu1 %386 }
 0x6de   :  { %v383_v1 = vpop.permute.xlu0 %382 }
 0x6df   :  { %v389_v4 = vsel %vm96_vm4, %v383_v1, %v387_v51 }
 0x6e0   :  { %v390_v5 = vpack.c.bf16 %v389_v4, %v389_v4 }
 0x6e2   :  { %1133 = vmatmul.msk.bf16.vlgmr.msrb.gmra.mxu0 %vm139_vm5, %v390_v5  ;;  %1134 = vmatmul.msk.bf16.vlgmr.msrb.gmra.mxu1 %vm139_vm5, %v390_v5 }
 0x6e3   :  { %894 = vmatpush.bf16.msrb.mxu0 %v1384_v30  ;;  %907 = vmatpush.bf16.msrb.mxu1 %v1395_v34 }
 0x6e7   :  { %895 = vmatpush.bf16.msrb.mxu0 %v1404_v37  ;;  %908 = vmatpush.bf16.msrb.mxu1 %v1408_v38 }
 0x6eb   :  { %896 = vmatpush.bf16.msrb.mxu0 %v1424_v43  ;;  %909 = vmatpush.bf16.msrb.mxu1 %v1428_v44 }
 0x6ef   :  { %897 = vmatpush.bf16.msrb.mxu0 %v1445_v50  ;;  %910 = vmatpush.bf16.msrb.mxu1 %v1450_v52 }
 0x75f   :  { %v403_v9 = vpop.f32.mrf.mxu0  ;;  %v416_v10 = vpop.f32.mrf.mxu1 }
 0x760   :  { %v420_v34 = vadd.f32 %v1490_v59, %v403_v9  ;;  %v467_v11 = vadd.f32 %v466_v8, %v416_v10 }
 0x762   :  { %1219 = vtanh.f32 %v420_v34  ;;  %v1135_v52 = vmul.f32 -1.442695, %v420_v34  ;;  %v1137_v14 = vmul.f32 -1.442695, %v467_v11 }
 0x763   :  { %1221 = vtanh.f32 %v467_v11 }
 0x764   :  { %1223 = vpow2.f32 %v1135_v52 }
 0x765   :  { %1225 = vpow2.f32 %v1137_v14 }
 0x767   :  { %v405_v38 = vpop.f32.mrf.mxu0  ;;  %v418_v12 = vpop.f32.mrf.mxu1 }
 0x768   :  { %v1220_v13 = vpop.eup %1219 }
 0x769   :  { %v1222_v44 = vpop.eup %1221  ;;  %443 = vrot.lane.b32.xlu0 %v1220_v13, %s1311_s30 }
 0x76a   :  { %490 = vrot.lane.b32.xlu1 %v1222_v44, %s1311_s30  ;;  %v1224_v15 = vpop.eup %1223 }
 0x76b   :  { %v1226_v16 = vpop.eup %1225  ;;  %v424_v17 = vadd.f32 1.0, %v1224_v15 }
 0x76c   :  { %v471_v18 = vadd.f32 1.0, %v1226_v16 }
 0x76d   :  { %1227 = vrcp.f32 %v424_v17  ;;  %v436_v29 = vand.u32 2147483648, %v424_v17  ;;  %vm430_vm10 = vweird.f32 %v424_v17  ;;  %v434_v32 = vand.u32 2147483647, %v424_v17 }
 0x76e   :  { %1229 = vrcp.f32 %v471_v18  ;;  %v483_v33 = vand.u32 2147483648, %v471_v18  ;;  %vm477_vm12 = vweird.f32 %v471_v18  ;;  %v481_v35 = vand.u32 2147483647, %v471_v18 }
 0x76f   :  { %v437_v39 = vor.u32 1.1754944e-38, %v436_v29  ;;  %vm435_vm14 = vcmp.eq.f32.partialorder %v434_v32, 8.507059e+37 }
 0x770   :  { %v484_v41 = vor.u32 1.1754944e-38, %v483_v33  ;;  %vm482_vm15 = vcmp.eq.f32.partialorder %v481_v35, 8.507059e+37 }
 0x773   :  { %v1228_v19 = vpop.eup %1227 }
 0x774   :  { %v1230_v20 = vpop.eup %1229  ;;  %v426_v21 = vmul.f32 %v1228_v19, %v424_v17  ;;  %vm431_vm8 = vweird.f32 %v1228_v19 }
 0x775   :  { %v473_v22 = vmul.f32 %v1230_v20, %v471_v18  ;;  %vm478_vm9 = vweird.f32 %v1230_v20  ;;  %vm432_vm11 = vmor %vm430_vm10, %vm431_vm8 }
 0x776   :  { %v427_v23 = vsub.f32 1.0, %v426_v21  ;;  %vm479_vm13 = vmor %vm477_vm12, %vm478_vm9 }
 0x777   :  { %v474_v24 = vsub.f32 1.0, %v473_v22 }
 0x778   :  { %v428_v26 = vmul.f32 %v1228_v19, %v427_v23 }
 0x779   :  { %v475_v27 = vmul.f32 %v1230_v20, %v474_v24 }
 0x77a   :  { %v429_v28 = vadd.f32 %v1228_v19, %v428_v26 }
 0x77b   :  { %v476_v31 = vadd.f32 %v1230_v20, %v475_v27 }
 0x77c   :  { %v433_v36 = vsel %vm432_vm11, %v1228_v19, %v429_v28 }
 0x77d   :  { %v480_v40 = vsel %vm479_vm13, %v1230_v20, %v476_v31  ;;  %v438_v45 = vsel %vm435_vm14, %v437_v39, %v433_v36 }
 0x77e   :  { %v485_v49 = vsel %vm482_vm15, %v484_v41, %v480_v40  ;;  %v441_v54 = vmul.f32 %v438_v45, %v1531_v55  ;;  %v1141_v55 = vld [vmem:[%s1705_s0 + $0x20] sm:$0xff] }
 0x77f   :  { %v488_v60 = vmul.f32 %v485_v49, %v1536_v25 }
 0x7db   :  { %v444_v42 = vpop.permute.xlu0 %443 }
 0x7dc   :  { %v446_v47 = vmul.f32 %v444_v42, %v438_v45  ;;  %v491_v48 = vpop.permute.xlu1 %490 }
 0x7dd   :  { %v493_v53 = vmul.f32 %v491_v48, %v485_v49 }
 0x7de   :  { %448 = vrot.lane.b32.xlu2 %v446_v47, %s1312_s8 }
 0x7df   :  { %495 = vrot.lane.b32.xlu0 %v493_v53, %s1312_s8 }
 0x838   :  { %v449_v56 = vpop.permute.xlu2 %448 }
 0x839   :  { %v1564_v57 = vadd.f32 %v449_v56, %v441_v54 }
 0x83b   :  { %1231 = vtanh.f32 %v1564_v57 }
 0x841   :  { %v1232_v58 = vpop.eup %1231 }
 0x842   :  { %454 = vrot.lane.b32.xlu1 %v1232_v58, %s1311_s30 }
 0x851   :  { %v496_v46 = vpop.permute.xlu0 %495 }
 0x852   :  { %v1569_v61 = vadd.f32 %v496_v46, %v488_v60 }
 0x854   :  { %1233 = vtanh.f32 %v1569_v61 }
 0x85a   :  { %v1234_v62 = vpop.eup %1233 }
 0x85b   :  { %501 = vrot.lane.b32.xlu2 %v1234_v62, %s1311_s30 }
 0x863   :  { %586 = vperm.xlu2 %1173, %v1141_v55  }
 0x8b4   :  { %v455_v63 = vpop.permute.xlu1 %454 }
 0x8b5   :  { %v457_v0 = vmul.f32 %v455_v63, %v438_v45  ;;  %v502_v51 = vpop.permute.xlu2 %501 }
 0x8b6   :  { %v504_v1 = vmul.f32 %v502_v51, %v485_v49 }
 0x8b7   :  { %510 = vrot.lane.b32.xlu1 %v457_v0, %s1311_s30 }
 0x8b8   :  { %506 = vrot.lane.b32.xlu0 %v504_v1, %s1312_s8 }
 0x8bd   :  { %v587_v7 = vpop.permute.xlu2 %586 }
 0x8be   :  { %v589_v8 = vmul.f32 %v1360_v2, %v587_v7 }
 0x8c0   :  { %v590_v9 = vadd.f32 %v1365_v3, %v589_v8 }
 0x929   :  { %v511_v25 = vpop.permute.xlu1 %510 }
 0x92a   :  { %v507_v4 = vpop.permute.xlu0 %506 }
 0x92b   :  { %v513_v5 = vsel %vm96_vm4, %v507_v4, %v511_v25 }
 0x92c   :  { %v514_v6 = vpack.c.bf16 %v513_v5, %v513_v5 }
 0x92e   :  { %1138 = vmatmul.msk.bf16.vlgmr.msrb.gmra.mxu2 %vm139_vm5, %v514_v6  ;;  %1139 = vmatmul.msk.bf16.vlgmr.msrb.gmra.mxu3 %vm139_vm5, %v514_v6 }
 0x92f   :  { %1018 = vmatpush.bf16.msrb.mxu2 %v1384_v30 }
 0x933   :  { %1019 = vmatpush.bf16.msrb.mxu2 %v1404_v37 }
 0x937   :  { %1020 = vmatpush.bf16.msrb.mxu2 %v1424_v43 }
 0x93b   :  { %1021 = vmatpush.bf16.msrb.mxu2 %v1445_v50 }
 0x9b1   :  { %v527_v10 = vpop.f32.mrf.mxu2  ;;  %v540_v34 = vpop.f32.mrf.mxu3 }
 0x9b2   :  { %v544_v11 = vadd.f32 %v1490_v59, %v527_v10  ;;  %v591_v38 = vadd.f32 %v590_v9, %v540_v34 }
 0x9b4   :  { %1235 = vtanh.f32 %v544_v11  ;;  %v1140_v43 = vmul.f32 -1.442695, %v544_v11  ;;  %v1142_v50 = vmul.f32 -1.442695, %v591_v38 }
 0x9b5   :  { %1237 = vtanh.f32 %v591_v38 }
 0x9b6   :  { %1239 = vpow2.f32 %v1140_v43 }
 0x9b7   :  { %1241 = vpow2.f32 %v1142_v50 }
 0x9b9   :  { %v529_v12 = vpop.f32.mrf.mxu2  ;;  %v542_v30 = vpop.f32.mrf.mxu3 }
 0x9ba   :  { %v1236_v13 = vpop.eup %1235 }
 0x9bb   :  { %v1238_v37 = vpop.eup %1237  ;;  %567 = vrot.lane.b32.xlu0 %v1236_v13, %s1311_s30 }
 0x9bc   :  { %614 = vrot.lane.b32.xlu1 %v1238_v37, %s1311_s30  ;;  %v1240_v44 = vpop.eup %1239 }
 0x9bd   :  { %v1242_v52 = vpop.eup %1241  ;;  %v548_v14 = vadd.f32 1.0, %v1240_v44 }
 0x9be   :  { %v595_v15 = vadd.f32 1.0, %v1242_v52 }
 0x9bf   :  { %1243 = vrcp.f32 %v548_v14  ;;  %v560_v26 = vand.u32 2147483648, %v548_v14  ;;  %vm554_vm2 = vweird.f32 %v548_v14  ;;  %v558_v28 = vand.u32 2147483647, %v548_v14 }
 0x9c0   :  { %1245 = vrcp.f32 %v595_v15  ;;  %v607_v29 = vand.u32 2147483648, %v595_v15  ;;  %vm601_vm6 = vweird.f32 %v595_v15  ;;  %v605_v31 = vand.u32 2147483647, %v595_v15 }
 0x9c1   :  { %v561_v33 = vor.u32 1.1754944e-38, %v560_v26  ;;  %vm559_vm8 = vcmp.eq.f32.partialorder %v558_v28, 8.507059e+37 }
 0x9c2   :  { %v608_v36 = vor.u32 1.1754944e-38, %v607_v29  ;;  %vm606_vm9 = vcmp.eq.f32.partialorder %v605_v31, 8.507059e+37 }
 0x9c5   :  { %v1244_v16 = vpop.eup %1243 }
 0x9c6   :  { %v1246_v17 = vpop.eup %1245  ;;  %v550_v18 = vmul.f32 %v1244_v16, %v548_v14  ;;  %vm555_vm0 = vweird.f32 %v1244_v16 }
 0x9c7   :  { %v597_v19 = vmul.f32 %v1246_v17, %v595_v15  ;;  %vm602_vm1 = vweird.f32 %v1246_v17  ;;  %vm556_vm3 = vmor %vm554_vm2, %vm555_vm0 }
 0x9c8   :  { %v551_v20 = vsub.f32 1.0, %v550_v18  ;;  %vm603_vm7 = vmor %vm601_vm6, %vm602_vm1 }
 0x9c9   :  { %v598_v21 = vsub.f32 1.0, %v597_v19 }
 0x9ca   :  { %v552_v22 = vmul.f32 %v1244_v16, %v551_v20 }
 0x9cb   :  { %v599_v23 = vmul.f32 %v1246_v17, %v598_v21 }
 0x9cc   :  { %v553_v24 = vadd.f32 %v1244_v16, %v552_v22 }
 0x9cd   :  { %v600_v27 = vadd.f32 %v1246_v17, %v599_v23 }
 0x9ce   :  { %v557_v32 = vsel %vm556_vm3, %v1244_v16, %v553_v24 }
 0x9cf   :  { %v604_v35 = vsel %vm603_vm7, %v1246_v17, %v600_v27  ;;  %v562_v40 = vsel %vm559_vm8, %v561_v33, %v557_v32 }
 0x9d0   :  { %v609_v45 = vsel %vm606_vm9, %v608_v36, %v604_v35  ;;  %v565_v48 = vmul.f32 %v562_v40, %v1564_v57  ;;  %v1146_v57 = vld [vmem:[%s1705_s0 + $0x28] sm:$0xff] }
 0x9d1   :  { %v612_v56 = vmul.f32 %v609_v45, %v1569_v61 }
 0xa2d   :  { %v568_v39 = vpop.permute.xlu0 %567 }
 0xa2e   :  { %v570_v41 = vmul.f32 %v568_v39, %v562_v40  ;;  %v615_v42 = vpop.permute.xlu1 %614 }
 0xa2f   :  { %v617_v47 = vmul.f32 %v615_v42, %v609_v45 }
 0xa30   :  { %572 = vrot.lane.b32.xlu2 %v570_v41, %s1312_s8 }
 0xa31   :  { %619 = vrot.lane.b32.xlu0 %v617_v47, %s1312_s8 }
 0xa8a   :  { %v573_v49 = vpop.permute.xlu2 %572 }
 0xa8b   :  { %v1593_v53 = vadd.f32 %v573_v49, %v565_v48 }
 0xa8d   :  { %1247 = vtanh.f32 %v1593_v53 }
 0xa93   :  { %v1248_v54 = vpop.eup %1247 }
 0xa94   :  { %578 = vrot.lane.b32.xlu1 %v1248_v54, %s1311_s30 }
 0xaa3   :  { %v620_v58 = vpop.permute.xlu0 %619 }
 0xaa4   :  { %v1598_v60 = vadd.f32 %v620_v58, %v612_v56 }
 0xaa6   :  { %1249 = vtanh.f32 %v1598_v60 }
 0xaac   :  { %v1250_v46 = vpop.eup %1249 }
 0xaad   :  { %625 = vrot.lane.b32.xlu2 %v1250_v46, %s1311_s30 }
 0xab5   :  { %710 = vperm.xlu2 %1173, %v1146_v57  }
 0xb06   :  { %v579_v62 = vpop.permute.xlu1 %578 }
 0xb07   :  { %v581_v55 = vmul.f32 %v579_v62, %v562_v40  ;;  %v626_v63 = vpop.permute.xlu2 %625 }
 0xb08   :  { %v628_v0 = vmul.f32 %v626_v63, %v609_v45 }
 0xb09   :  { %634 = vrot.lane.b32.xlu1 %v581_v55, %s1311_s30 }
 0xb0a   :  { %630 = vrot.lane.b32.xlu0 %v628_v0, %s1312_s8 }
 0xb0f   :  { %v711_v4 = vpop.permute.xlu2 %710 }
 0xb10   :  { %v713_v5 = vmul.f32 %v1360_v2, %v711_v4 }
 0xb12   :  { %v714_v6 = vadd.f32 %v1365_v3, %v713_v5 }
 0xb7b   :  { %v635_v61 = vpop.permute.xlu1 %634 }
 0xb7c   :  { %v631_v51 = vpop.permute.xlu0 %630 }
 0xb7d   :  { %v637_v1 = vsel %vm96_vm4, %v631_v51, %v635_v61  ;;  %v1638_v61 = vld [vmem:[%s1706_s1] ss:$0 sm:$0xff] }
 0xb7e   :  { %v638_v25 = vpack.c.bf16 %v637_v1, %v637_v1  ;;  %v1644_v1 = vld [vmem:[%s1707_s2] ss:$0 sm:$0xff] }
 0xb80   :  { %1143 = vmatmul.msk.bf16.vlgmr.msra.gmra.mxu0 %vm139_vm5, %v638_v25  ;;  %1144 = vmatmul.msk.bf16.vlgmr.msra.gmra.mxu1 %vm139_vm5, %v638_v25 }
 0xbfd   :  { %v651_v7 = vpop.f32.mrf.mxu0  ;;  %v664_v8 = vpop.f32.mrf.mxu1 }
 0xbfe   :  { %v668_v9 = vadd.f32 %v1490_v59, %v651_v7  ;;  %v715_v10 = vadd.f32 %v714_v6, %v664_v8 }
 0xc00   :  { %1251 = vtanh.f32 %v668_v9  ;;  %v1145_v30 = vmul.f32 -1.442695, %v668_v9  ;;  %v1147_v13 = vmul.f32 -1.442695, %v715_v10 }
 0xc01   :  { %1253 = vtanh.f32 %v715_v10 }
 0xc02   :  { %1255 = vpow2.f32 %v1145_v30 }
 0xc03   :  { %1257 = vpow2.f32 %v1147_v13 }
 0xc05   :  { %v653_v34 = vpop.f32.mrf.mxu0  ;;  %v666_v11 = vpop.f32.mrf.mxu1 }
 0xc06   :  { %v1252_v38 = vpop.eup %1251 }
 0xc07   :  { %v1254_v12 = vpop.eup %1253  ;;  %691 = vrot.lane.b32.xlu0 %v1252_v38, %s1311_s30 }
 0xc08   :  { %738 = vrot.lane.b32.xlu1 %v1254_v12, %s1311_s30  ;;  %v1256_v2 = vpop.eup %1255 }
 0xc09   :  { %v1258_v3 = vpop.eup %1257  ;;  %v672_v37 = vadd.f32 1.0, %v1256_v2 }
 0xc0a   :  { %v719_v43 = vadd.f32 1.0, %v1258_v3 }
 0xc0b   :  { %1259 = vrcp.f32 %v672_v37  ;;  %v684_v20 = vand.u32 2147483648, %v672_v37  ;;  %vm678_vm12 = vweird.f32 %v672_v37  ;;  %v682_v22 = vand.u32 2147483647, %v672_v37 }
 0xc0c   :  { %1261 = vrcp.f32 %v719_v43  ;;  %v731_v23 = vand.u32 2147483648, %v719_v43  ;;  %vm725_vm14 = vweird.f32 %v719_v43  ;;  %v729_v24 = vand.u32 2147483647, %v719_v43 }
 0xc0d   :  { %v685_v27 = vor.u32 1.1754944e-38, %v684_v20  ;;  %vm683_vm0 = vcmp.eq.f32.partialorder %v682_v22, 8.507059e+37 }
 0xc0e   :  { %v732_v29 = vor.u32 1.1754944e-38, %v731_v23  ;;  %vm730_vm1 = vcmp.eq.f32.partialorder %v729_v24, 8.507059e+37 }
 0xc11   :  { %v1260_v50 = vpop.eup %1259 }
 0xc12   :  { %v1262_v44 = vpop.eup %1261  ;;  %v674_v52 = vmul.f32 %v1260_v50, %v672_v37  ;;  %vm679_vm10 = vweird.f32 %v1260_v50 }
 0xc13   :  { %v721_v14 = vmul.f32 %v1262_v44, %v719_v43  ;;  %vm726_vm11 = vweird.f32 %v1262_v44  ;;  %vm680_vm13 = vmor %vm678_vm12, %vm679_vm10 }
 0xc14   :  { %v675_v15 = vsub.f32 1.0, %v674_v52  ;;  %vm727_vm15 = vmor %vm725_vm14, %vm726_vm11 }
 0xc15   :  { %v722_v16 = vsub.f32 1.0, %v721_v14 }
 0xc16   :  { %v676_v17 = vmul.f32 %v1260_v50, %v675_v15 }
 0xc17   :  { %v723_v18 = vmul.f32 %v1262_v44, %v722_v16 }
 0xc18   :  { %v677_v19 = vadd.f32 %v1260_v50, %v676_v17 }
 0xc19   :  { %v724_v21 = vadd.f32 %v1262_v44, %v723_v18 }
 0xc1a   :  { %v681_v26 = vsel %vm680_vm13, %v1260_v50, %v677_v19 }
 0xc1b   :  { %v728_v28 = vsel %vm727_vm15, %v1262_v44, %v724_v21  ;;  %v686_v32 = vsel %vm683_vm0, %v685_v27, %v681_v26 }
 0xc1c   :  { %v733_v36 = vsel %vm730_vm1, %v732_v29, %v728_v28  ;;  %v689_v40 = vmul.f32 %v686_v32, %v1593_v53  ;;  %v1151_v53 = vld [vmem:[%s1705_s0 + $0x30] sm:$0xff] }
 0xc1d   :  { %v736_v47 = vmul.f32 %v733_v36, %v1598_v60 }
 0xc79   :  { %v692_v31 = vpop.permute.xlu0 %691 }
 0xc7a   :  { %v694_v33 = vmul.f32 %v692_v31, %v686_v32  ;;  %v739_v35 = vpop.permute.xlu1 %738 }
 0xc7b   :  { %v741_v39 = vmul.f32 %v739_v35, %v733_v36 }
 0xc7c   :  { %696 = vrot.lane.b32.xlu2 %v694_v33, %s1312_s8 }
 0xc7d   :  { %743 = vrot.lane.b32.xlu0 %v741_v39, %s1312_s8 }
 0xcd6   :  { %v697_v41 = vpop.permute.xlu2 %696 }
 0xcd7   :  { %v1618_v42 = vadd.f32 %v697_v41, %v689_v40 }
 0xcd9   :  { %1263 = vtanh.f32 %v1618_v42 }
 0xcdf   :  { %v1264_v45 = vpop.eup %1263 }
 0xce0   :  { %702 = vrot.lane.b32.xlu1 %v1264_v45, %s1311_s30 }
 0xcef   :  { %v744_v48 = vpop.permute.xlu0 %743 }
 0xcf0   :  { %v1623_v49 = vadd.f32 %v744_v48, %v736_v47 }
 0xcf2   :  { %1265 = vtanh.f32 %v1623_v49 }
 0xcf8   :  { %v1266_v54 = vpop.eup %1265 }
 0xcf9   :  { %749 = vrot.lane.b32.xlu2 %v1266_v54, %s1311_s30 }
 0xd01   :  { %834 = vperm.xlu2 %1173, %v1151_v53  }
 0xd52   :  { %v703_v56 = vpop.permute.xlu1 %702 }
 0xd53   :  { %v705_v58 = vmul.f32 %v703_v56, %v686_v32  ;;  %v750_v46 = vpop.permute.xlu2 %749 }
 0xd54   :  { %v752_v57 = vmul.f32 %v750_v46, %v733_v36 }
 0xd55   :  { %758 = vrot.lane.b32.xlu1 %v705_v58, %s1311_s30 }
 0xd56   :  { %754 = vrot.lane.b32.xlu0 %v752_v57, %s1312_s8 }
 0xd5b   :  { %v835_v0 = vpop.permute.xlu2 %834 }
 0xd5c   :  { %v837_v51 = vmul.f32 %v1638_v61, %v835_v0 }
 0xd5e   :  { %v838_v25 = vadd.f32 %v1644_v1, %v837_v51  ;;  %v1675_v51 = vld [vmem:[%s1709_s4] ss:$0 sm:$0xff] }
 0xdc7   :  { %v759_v60 = vpop.permute.xlu1 %758 }
 0xdc8   :  { %v755_v62 = vpop.permute.xlu0 %754 }
 0xdc9   :  { %v761_v55 = vsel %vm96_vm4, %v755_v62, %v759_v60 }
 0xdca   :  { %v762_v63 = vpack.c.bf16 %v761_v55, %v761_v55 }
 0xdcc   :  { %1148 = vmatmul.msk.bf16.vlgmr.msra.gmra.mxu2 %vm139_vm5, %v762_v63  ;;  %1149 = vmatmul.msk.bf16.vlgmr.msra.gmra.mxu3 %vm139_vm5, %v762_v63 }
 0xe4f   :  { %v775_v4 = vpop.f32.mrf.mxu2  ;;  %v788_v5 = vpop.f32.mrf.mxu3 }
 0xe50   :  { %v792_v6 = vadd.f32 %v1490_v59, %v775_v4  ;;  %v839_v7 = vadd.f32 %v838_v25, %v788_v5 }
 0xe52   :  { %1267 = vtanh.f32 %v792_v6  ;;  %v1150_v11 = vmul.f32 -1.442695, %v792_v6  ;;  %v1152_v38 = vmul.f32 -1.442695, %v839_v7 }
 0xe53   :  { %1269 = vtanh.f32 %v839_v7 }
 0xe54   :  { %1271 = vpow2.f32 %v1150_v11 }
 0xe55   :  { %1273 = vpow2.f32 %v1152_v38 }
 0xe57   :  { %v777_v8 = vpop.f32.mrf.mxu2  ;;  %v790_v9 = vpop.f32.mrf.mxu3 }
 0xe58   :  { %v1268_v10 = vpop.eup %1267 }
 0xe59   :  { %v1270_v34 = vpop.eup %1269  ;;  %815 = vrot.lane.b32.xlu0 %v1268_v10, %s1311_s30 }
 0xe5a   :  { %862 = vrot.lane.b32.xlu1 %v1270_v34, %s1311_s30  ;;  %v1272_v12 = vpop.eup %1271 }
 0xe5b   :  { %v1274_v30 = vpop.eup %1273  ;;  %v796_v13 = vadd.f32 1.0, %v1272_v12 }
 0xe5c   :  { %v843_v2 = vadd.f32 1.0, %v1274_v30 }
 0xe5d   :  { %1275 = vrcp.f32 %v796_v13  ;;  %v808_v16 = vand.u32 2147483648, %v796_v13  ;;  %vm802_vm6 = vweird.f32 %v796_v13  ;;  %v806_v18 = vand.u32 2147483647, %v796_v13 }
 0xe5e   :  { %1277 = vrcp.f32 %v843_v2  ;;  %v855_v19 = vand.u32 2147483648, %v843_v2  ;;  %vm849_vm8 = vweird.f32 %v843_v2  ;;  %v853_v20 = vand.u32 2147483647, %v843_v2 }
 0xe5f   :  { %v809_v22 = vor.u32 1.1754944e-38, %v808_v16  ;;  %vm807_vm10 = vcmp.eq.f32.partialorder %v806_v18, 8.507059e+37 }
 0xe60   :  { %v856_v24 = vor.u32 1.1754944e-38, %v855_v19  ;;  %vm854_vm11 = vcmp.eq.f32.partialorder %v853_v20, 8.507059e+37 }
 0xe63   :  { %v1276_v59 = vpop.eup %1275 }
 0xe64   :  { %v1278_v3 = vpop.eup %1277  ;;  %v798_v37 = vmul.f32 %v1276_v59, %v796_v13  ;;  %vm803_vm2 = vweird.f32 %v1276_v59 }
 0xe65   :  { %v845_v43 = vmul.f32 %v1278_v3, %v843_v2  ;;  %vm850_vm3 = vweird.f32 %v1278_v3  ;;  %vm804_vm7 = vmor %vm802_vm6, %vm803_vm2 }
 0xe66   :  { %v799_v50 = vsub.f32 1.0, %v798_v37  ;;  %vm851_vm9 = vmor %vm849_vm8, %vm850_vm3 }
 0xe67   :  { %v846_v44 = vsub.f32 1.0, %v845_v43 }
 0xe68   :  { %v800_v52 = vmul.f32 %v1276_v59, %v799_v50 }
 0xe69   :  { %v847_v14 = vmul.f32 %v1278_v3, %v846_v44 }
 0xe6a   :  { %v801_v15 = vadd.f32 %v1276_v59, %v800_v52 }
 0xe6b   :  { %v848_v17 = vadd.f32 %v1278_v3, %v847_v14 }
 0xe6c   :  { %v805_v21 = vsel %vm804_vm7, %v1276_v59, %v801_v15 }
 0xe6d   :  { %v852_v23 = vsel %vm851_vm9, %v1278_v3, %v848_v17  ;;  %v810_v27 = vsel %vm807_vm10, %v809_v22, %v805_v21  ;;  %vm1084_vm9 = vcmask 7168  }
 0xe6e   :  { %v857_v31 = vsel %vm854_vm11, %v856_v24, %v852_v23  ;;  %v813_v33 = vmul.f32 %v810_v27, %v1618_v42  ;;  %v1156_v42 = vld [vmem:[%s1705_s0 + $0x38] sm:$0xff] }
 0xe6f   :  { %v860_v40 = vmul.f32 %v857_v31, %v1623_v49 }
 0xecb   :  { %v816_v26 = vpop.permute.xlu0 %815 }
 0xecc   :  { %v818_v28 = vmul.f32 %v816_v26, %v810_v27  ;;  %v863_v29 = vpop.permute.xlu1 %862 }
 0xecd   :  { %v865_v32 = vmul.f32 %v863_v29, %v857_v31 }
 0xece   :  { %820 = vrot.lane.b32.xlu2 %v818_v28, %s1312_s8 }
 0xecf   :  { %867 = vrot.lane.b32.xlu0 %v865_v32, %s1312_s8 }
 0xf28   :  { %v821_v35 = vpop.permute.xlu2 %820 }
 0xf29   :  { %v1653_v36 = vadd.f32 %v821_v35, %v813_v33 }
 0xf2b   :  { %1279 = vtanh.f32 %v1653_v36 }
 0xf31   :  { %v1280_v39 = vpop.eup %1279 }
 0xf32   :  { %826 = vrot.lane.b32.xlu1 %v1280_v39, %s1311_s30 }
 0xf41   :  { %v868_v41 = vpop.permute.xlu0 %867 }
 0xf42   :  { %v1658_v45 = vadd.f32 %v868_v41, %v860_v40 }
 0xf44   :  { %1281 = vtanh.f32 %v1658_v45 }
 0xf4a   :  { %v1282_v47 = vpop.eup %1281 }
 0xf4b   :  { %873 = vrot.lane.b32.xlu2 %v1282_v47, %s1311_s30 }
 0xf53   :  { %958 = vperm.xlu2 %1173, %v1156_v42  }
 0xfa4   :  { %v827_v48 = vpop.permute.xlu1 %826 }
 0xfa5   :  { %v829_v54 = vmul.f32 %v827_v48, %v810_v27  ;;  %v874_v53 = vpop.permute.xlu2 %873 }
 0xfa6   :  { %v876_v56 = vmul.f32 %v874_v53, %v857_v31 }
 0xfa7   :  { %882 = vrot.lane.b32.xlu1 %v829_v54, %s1311_s30 }
 0xfa8   :  { %878 = vrot.lane.b32.xlu0 %v876_v56, %s1312_s8 }
 0xfad   :  { %v959_v60 = vpop.permute.xlu2 %958 }
 0xfae   :  { %v961_v62 = vmul.f32 %v1638_v61, %v959_v60 }
 0xfb0   :  { %v962_v55 = vadd.f32 %v1644_v1, %v961_v62 }
0x1019   :  { %v883_v49 = vpop.permute.xlu1 %882 }
0x101a   :  { %v879_v58 = vpop.permute.xlu0 %878 }
0x101b   :  { %v885_v46 = vsel %vm96_vm4, %v879_v58, %v883_v49 }
0x101c   :  { %v886_v57 = vpack.c.bf16 %v885_v46, %v885_v46 }
0x101e   :  { %1153 = vmatmul.msk.bf16.vlgmr.msrb.gmra.mxu0 %vm139_vm5, %v886_v57  ;;  %1154 = vmatmul.msk.bf16.vlgmr.msrb.gmra.mxu1 %vm139_vm5, %v886_v57 }
0x109b   :  { %v899_v63 = vpop.f32.mrf.mxu0  ;;  %v912_v0 = vpop.f32.mrf.mxu1 }
0x109c   :  { %v916_v25 = vadd.f32 %v1675_v51, %v899_v63  ;;  %v963_v4 = vadd.f32 %v962_v55, %v912_v0 }
0x109e   :  { %1283 = vtanh.f32 %v916_v25  ;;  %v1155_v61 = vmul.f32 -1.442695, %v916_v25  ;;  %v1157_v1 = vmul.f32 -1.442695, %v963_v4 }
0x109f   :  { %1285 = vtanh.f32 %v963_v4 }
0x10a0   :  { %1287 = vpow2.f32 %v1155_v61 }
0x10a1   :  { %1289 = vpow2.f32 %v1157_v1  ;;  %v1177_v1 = vld [vmem:[%s1710_s5] ss:$0 sm:$0xff] }
0x10a3   :  { %v901_v5 = vpop.f32.mrf.mxu0  ;;  %v914_v6 = vpop.f32.mrf.mxu1 }
0x10a4   :  { %v1284_v7 = vpop.eup %1283 }
0x10a5   :  { %v1286_v8 = vpop.eup %1285  ;;  %939 = vrot.lane.b32.xlu0 %v1284_v7, %s1311_s30 }
0x10a6   :  { %986 = vrot.lane.b32.xlu1 %v1286_v8, %s1311_s30  ;;  %v1288_v9 = vpop.eup %1287 }
0x10a7   :  { %v1290_v10 = vpop.eup %1289  ;;  %v920_v34 = vadd.f32 1.0, %v1288_v9 }
0x10a8   :  { %v967_v11 = vadd.f32 1.0, %v1290_v10 }
0x10a9   :  { %1291 = vrcp.f32 %v920_v34  ;;  %v932_v50 = vand.u32 2147483648, %v920_v34  ;;  %vm926_vm14 = vweird.f32 %v920_v34  ;;  %v930_v52 = vand.u32 2147483647, %v920_v34 }
0x10aa   :  { %1293 = vrcp.f32 %v967_v11  ;;  %v979_v14 = vand.u32 2147483648, %v967_v11  ;;  %vm973_vm0 = vweird.f32 %v967_v11  ;;  %v977_v15 = vand.u32 2147483647, %v967_v11 }
0x10ab   :  { %v933_v17 = vor.u32 1.1754944e-38, %v932_v50  ;;  %vm931_vm2 = vcmp.eq.f32.partialorder %v930_v52, 8.507059e+37 }
0x10ac   :  { %v980_v19 = vor.u32 1.1754944e-38, %v979_v14  ;;  %vm978_vm3 = vcmp.eq.f32.partialorder %v977_v15, 8.507059e+37 }
0x10af   :  { %v1292_v38 = vpop.eup %1291 }
0x10b0   :  { %v1294_v12 = vpop.eup %1293  ;;  %v922_v30 = vmul.f32 %v1292_v38, %v920_v34  ;;  %vm927_vm12 = vweird.f32 %v1292_v38 }
0x10b1   :  { %v969_v13 = vmul.f32 %v1294_v12, %v967_v11  ;;  %vm974_vm13 = vweird.f32 %v1294_v12  ;;  %vm928_vm15 = vmor %vm926_vm14, %vm927_vm12 }
0x10b2   :  { %v923_v2 = vsub.f32 1.0, %v922_v30  ;;  %vm975_vm1 = vmor %vm973_vm0, %vm974_vm13 }
0x10b3   :  { %v970_v59 = vsub.f32 1.0, %v969_v13 }
0x10b4   :  { %v924_v3 = vmul.f32 %v1292_v38, %v923_v2  ;;  %v12_v2 = vstv %s1711_s6 }
0x10b5   :  { %v971_v37 = vmul.f32 %v1294_v12, %v970_v59  ;;  %13 = vst [vmem:[#allocation2] sm:$0x1] %v12_v2 }
0x10b6   :  { %v925_v43 = vadd.f32 %v1292_v38, %v924_v3 }
0x10b7   :  { %v972_v44 = vadd.f32 %v1294_v12, %v971_v37 }
0x10b8   :  { %v929_v16 = vsel %vm928_vm15, %v1292_v38, %v925_v43 }
0x10b9   :  { %v976_v18 = vsel %vm975_vm1, %v1294_v12, %v972_v44  ;;  %v934_v21 = vsel %vm931_vm2, %v933_v17, %v929_v16 }
0x10ba   :  { %v981_v24 = vsel %vm978_vm3, %v980_v19, %v976_v18  ;;  %v937_v27 = vmul.f32 %v934_v21, %v1653_v36 }
0x10bb   :  { %v984_v32 = vmul.f32 %v981_v24, %v1658_v45 }
0x10bc   :  { %v1178_v37 = vld [vmem:[#allocation2] ss:$0 sm:$0xff] }
0x1117   :  { %v940_v20 = vpop.permute.xlu0 %939 }
0x1118   :  { %v942_v22 = vmul.f32 %v940_v20, %v934_v21  ;;  %v987_v23 = vpop.permute.xlu1 %986 }
0x1119   :  { %v989_v26 = vmul.f32 %v987_v23, %v981_v24 }
0x111a   :  { %944 = vrot.lane.b32.xlu2 %v942_v22, %s1312_s8 }
0x111b   :  { %991 = vrot.lane.b32.xlu0 %v989_v26, %s1312_s8 }
0x1174   :  { %v945_v28 = vpop.permute.xlu2 %944 }
0x1175   :  { %v947_v29 = vadd.f32 %v945_v28, %v937_v27 }
0x1177   :  { %1295 = vtanh.f32 %v947_v29 }
0x117d   :  { %v1296_v31 = vpop.eup %1295 }
0x117e   :  { %950 = vrot.lane.b32.xlu1 %v1296_v31, %s1311_s30 }
0x118d   :  { %v992_v33 = vpop.permute.xlu0 %991 }
0x118e   :  { %v994_v35 = vadd.f32 %v992_v33, %v984_v32 }
0x1190   :  { %1297 = vtanh.f32 %v994_v35 }
0x1196   :  { %v1298_v39 = vpop.eup %1297 }
0x1197   :  { %997 = vrot.lane.b32.xlu2 %v1298_v39, %s1311_s30 }
0x11f0   :  { %v951_v40 = vpop.permute.xlu1 %950 }
0x11f1   :  { %v953_v41 = vmul.f32 %v951_v40, %v934_v21  ;;  %v998_v47 = vpop.permute.xlu2 %997 }
0x11f2   :  { %v1000_v42 = vmul.f32 %v998_v47, %v981_v24 }
0x11f3   :  { %1006 = vrot.lane.b32.xlu1 %v953_v41, %s1311_s30 }
0x11f4   :  { %1002 = vrot.lane.b32.xlu0 %v1000_v42, %s1312_s8 }
0x1265   :  { %v1007_v36 = vpop.permute.xlu1 %1006 }
0x1266   :  { %v1003_v48 = vpop.permute.xlu0 %1002 }
0x1267   :  { %v1009_v54 = vsel %vm96_vm4, %v1003_v48, %v1007_v36 }
0x1268   :  { %v1010_v53 = vpack.c.bf16 %v1009_v54, %v1009_v54 }
0x126a   :  { %1158 = vmatmul.msk.bf16.vlgmr.msrb.gmra.mxu2 %vm139_vm5, %v1010_v53 }
0x12ed   :  { %v1023_v45 = vpop.f32.mrf.mxu2 }
0x12ee   :  { %v1027_v56 = vadd.f32 %v1675_v51, %v1023_v45 }
0x12f0   :  { %1299 = vtanh.f32 %v1027_v56  ;;  %v1159_v46 = vmul.f32 -1.442695, %v1027_v56 }
0x12f2   :  { %1301 = vpow2.f32 %v1159_v46 }
0x12f5   :  { %v1025_v49 = vpop.f32.mrf.mxu2 }
0x12f6   :  { %v1300_v58 = vpop.eup %1299 }
0x12f7   :  { %1050 = vrot.lane.b32.xlu2 %v1300_v58, %s1311_s30 }
0x12f8   :  { %v1302_v57 = vpop.eup %1301 }
0x12f9   :  { %v1031_v60 = vadd.f32 1.0, %v1302_v57 }
0x12fb   :  { %1303 = vrcp.f32 %v1031_v60  ;;  %v1043_v4 = vand.u32 2147483648, %v1031_v60  ;;  %vm1037_vm5 = vweird.f32 %v1031_v60  ;;  %v1041_v5 = vand.u32 2147483647, %v1031_v60 }
0x12fd   :  { %v1044_v6 = vor.u32 1.1754944e-38, %v1043_v4  ;;  %vm1042_vm8 = vcmp.eq.f32.partialorder %v1041_v5, 8.507059e+37 }
0x12ff   :  { %1068 = vrot.lane.b32.xlu2 %v1177_v1, %s1313_s18 }
0x1301   :  { %v1304_v62 = vpop.eup %1303 }
0x1302   :  { %v1033_v55 = vmul.f32 %v1304_v62, %v1031_v60  ;;  %vm1038_vm6 = vweird.f32 %v1304_v62 }
0x1303   :  { %vm1039_vm7 = vmor %vm1037_vm5, %vm1038_vm6 }
0x1304   :  { %v1034_v63 = vsub.f32 1.0, %v1033_v55 }
0x1306   :  { %v1035_v0 = vmul.f32 %v1304_v62, %v1034_v63 }
0x1308   :  { %v1036_v25 = vadd.f32 %v1304_v62, %v1035_v0 }
0x130a   :  { %v1040_v51 = vsel %vm1039_vm7, %v1304_v62, %v1036_v25 }
0x130b   :  { %v1045_v8 = vsel %vm1042_vm8, %v1044_v6, %v1040_v51 }
0x130c   :  { %v1048_v9 = vmul.f32 %v1045_v8, %v947_v29 }
0x1351   :  { %v1051_v7 = vpop.permute.xlu2 %1050 }
0x1352   :  { %v1053_v61 = vmul.f32 %v1051_v7, %v1045_v8 }
0x1354   :  { %1055 = vrot.lane.b32.xlu0 %v1053_v61, %s1312_s8 }
0x1359   :  { %v1069_v12 = vpop.permute.xlu2 %1068 }
0x13c6   :  { %v1056_v10 = vpop.permute.xlu0 %1055 }
0x13c7   :  { %v1058_v34 = vadd.f32 %v1056_v10, %v1048_v9 }
0x13c9   :  { %1305 = vtanh.f32 %v1058_v34 }
0x13cf   :  { %v1306_v11 = vpop.eup %1305 }
0x13d0   :  { %1061 = vrot.lane.b32.xlu1 %v1306_v11, %s1311_s30 }
0x1442   :  { %v1062_v38 = vpop.permute.xlu1 %1061 }
0x1443   :  { %v1064_v30 = vmul.f32 %v1062_v38, %v1045_v8 }
0x1445   :  { %v1071_v13 = vmul.f32 %v1069_v12, %v1064_v30 }
0x1447   :  { %1073 = vrot.lane.b32.xlu0 %v1071_v13, %s1312_s8 }
0x14b9   :  { %v1074_v59 = vpop.permute.xlu0 %1073 }
0x14ba   :  { %v1076_v3 = vsel %vm96_vm4, %v1074_v59, 0.0 }
0x14bb   :  { %1077 = vadd.xlane.f32.xlu1 %v1076_v3 }
0x152e   :  { %v1078_v43 = vpop.xlane.xlu1 %1077 }
0x152f   :  { %v1083_v50 = vadd.f32 %v1178_v37, %v1078_v43 }
0x1531   :  { %1085 = vst.msk [vmem:[%s1712_s7] sm:$0xff] %vm1084_vm9, %v1083_v50 }

</bundles_post_ra>
